<compile_context>
chip_gen: v7x
topology: tpu7x:2x2x1
jax: 0.10.0
libtpu: 0.0.40
codegen_flags: <defaults>
</compile_context>

<pallas_src>
import functools
import math

import numpy as np

import jax
import jax.numpy as jnp
from jax.experimental import pallas as pl
from jax.experimental.pallas import tpu as pltpu


def _round_up(x, m):
    return (x + m - 1) // m * m


# -----------------------------------------------------------------------------
# Fused conv kernel: in-kernel im2col (per-tap accumulation) + bias + ReLU, with
# an optional fused 1x1 classifier applied to the VMEM-resident activation.
# -----------------------------------------------------------------------------
def _conv_tap_kernel(x_ref, w_ref, b_ref, *rest, taps, stride, relu, ho, wo, fused):
    """x_ref : (S*S, Hq, Wq, Cin)  phase-split, spatially padded input (one sample)
       w_ref : (kh*kw, Cin, Cmid)  bf16 tap-major conv weights
       b_ref : (1, Cmid)           f32 bias
       fused : also wc_ref (Cmid, Ccls) bf16, bc_ref (1, Ccls) f32 -> classifier logits
       o_ref : (ho, wo, Cout)
    """
    if fused:
        wc_ref, bc_ref, o_ref = rest
    else:
        (o_ref,) = rest

    cin = w_ref.shape[1]
    cmid = w_ref.shape[2]

    acc = jnp.zeros((ho * wo, cmid), jnp.float32)
    for t, (di, dj) in enumerate(taps):
        ph = (di % stride) * stride + (dj % stride)       # phase slab for this tap
        r0, c0 = di // stride, dj // stride
        xs = x_ref[ph, r0:r0 + ho, c0:c0 + wo, :]          # unit-stride static window
        acc = acc + jnp.dot(xs.reshape(ho * wo, cin), w_ref[t],
                            preferred_element_type=jnp.float32)

    acc = acc + b_ref[...]
    if relu:
        acc = jnp.maximum(acc, 0.0)

    if fused:
        # 1x1 classifier on the resident activation: no HBM round trip of the head feature.
        out = jnp.dot(acc.astype(jnp.bfloat16), wc_ref[...],
                      preferred_element_type=jnp.float32) + bc_ref[...]
    else:
        out = acc

    cout = o_ref.shape[-1]
    o_ref[...] = out.reshape(ho, wo, cout).astype(o_ref.dtype)


def _phase_split(x, ksize, stride, pad, ho, wo):
    """(N, H, W, C) -> (N, S*S, Hq, Wq, C): zero-pad + split into stride phases so every
    conv tap inside the kernel is a unit-stride static slice (no strided VMEM access)."""
    N, H, W, C = x.shape
    Hq = (ksize - 1) // stride + ho
    Wq = (ksize - 1) // stride + wo
    Hp, Wp = Hq * stride, Wq * stride
    assert Hp >= H + pad and Wp >= W + pad
    xp = jnp.pad(x, ((0, 0), (pad, Hp - H - pad), (pad, Wp - W - pad), (0, 0)))
    if stride == 1:
        return xp[:, None], Hq, Wq
    xr = xp.reshape(N, Hq, stride, Wq, stride, C)
    xr = jnp.transpose(xr, (0, 2, 4, 1, 3, 5))
    return xr.reshape(N, stride * stride, Hq, Wq, C), Hq, Wq


def conv2d_nhwc(x, wtaps, bias, *, ksize, stride, pad, relu,
                wcls=None, bcls=None, out_dtype=jnp.bfloat16):
    """x: (N, H, W, Cin) bf16.  wtaps: (k*k, Cin, Cmid) bf16.  bias: (1, Cmid) f32.
    Optional fused 1x1 classifier wcls (Cmid, Ccls) bf16 / bcls (1, Ccls) f32."""
    N, H, W, Cin = x.shape
    T, Cin_w, Cmid = wtaps.shape
    assert T == ksize * ksize and Cin_w == Cin, (wtaps.shape, x.shape)

    Ho = (H + 2 * pad - ksize) // stride + 1
    Wo = (W + 2 * pad - ksize) // stride + 1
    Wo_p = _round_up(Wo, 8)        # 8-aligned compute width -> sublane-trivial reshapes
    x_ph, Hq, Wq = _phase_split(x, ksize, stride, pad, Ho, Wo_p)
    S2 = stride * stride
    taps = tuple((di, dj) for di in range(ksize) for dj in range(ksize))

    fused = wcls is not None
    Cout = wcls.shape[-1] if fused else Cmid

    in_specs = [
        pl.BlockSpec((None, S2, Hq, Wq, Cin), lambda n: (n, 0, 0, 0, 0)),
        pl.BlockSpec((T, Cin, Cmid), lambda n: (0, 0, 0)),
        pl.BlockSpec((1, Cmid), lambda n: (0, 0)),
    ]
    args = [x_ph, wtaps, bias]
    if fused:
        in_specs += [pl.BlockSpec(wcls.shape, lambda n: (0, 0)),
                     pl.BlockSpec(bcls.shape, lambda n: (0, 0))]
        args += [wcls, bcls]

    kernel = functools.partial(_conv_tap_kernel, taps=taps, stride=stride,
                               relu=relu, ho=Ho, wo=Wo_p, fused=fused)
    out = pl.pallas_call(
        kernel,
        out_shape=jax.ShapeDtypeStruct((N, Ho, Wo_p, Cout), out_dtype),
        grid=(N,),                                           # batch: >=2 parallel steps (v7x)
        in_specs=in_specs,
        out_specs=pl.BlockSpec((None, Ho, Wo_p, Cout), lambda n: (n, 0, 0, 0)),
        compiler_params=pltpu.CompilerParams(dimension_semantics=("parallel",)),
    )(*args)
    return out[:, :, :Wo, :] if Wo_p != Wo else out


# -----------------------------------------------------------------------------
# Bilinear upsample (F.interpolate, mode='bilinear', align_corners=False):
# two plain 2D MXU matmuls per block, lane-dense output, no broadcasts.
# -----------------------------------------------------------------------------
def _interp_matrix(out_size, in_size):
    scale = in_size / out_size
    m = np.zeros((out_size, in_size), dtype=np.float32)
    for i in range(out_size):
        src = max((i + 0.5) * scale - 0.5, 0.0)
        i0 = min(int(np.floor(src)), in_size - 1)
        i1 = min(i0 + 1, in_size - 1)
        w1 = src - i0
        m[i, i0] += 1.0 - w1
        m[i, i1] += w1
    return m


def _bilinear_kernel(a_ref, x_ref, bblk_ref, o_ref):
    # H-interp: (tr, Hi) @ (Hi, tC*Wi) -> (tr, tC*Wi); bf16 input upcast in-kernel.
    t = jnp.dot(a_ref[...], x_ref[...].astype(jnp.float32),
                preferred_element_type=jnp.float32)
    # W-interp with a block-diagonal matrix: output columns are (channel, Wo) flattened
    # -> lane-dense stores, no per-channel broadcast of the interpolation weights.
    o_ref[...] = jnp.dot(t, bblk_ref[...],
                         preferred_element_type=jnp.float32).astype(o_ref.dtype)


def bilinear_upsample_nchw(x_nhwc, out_hw):
    """x_nhwc: (N, Hi, Wi, C) bf16 -> (N, C, Ho, Wo) f32, align_corners=False."""
    N, Hi, Wi, C = x_nhwc.shape
    Ho, Wo = out_hw
    NC = N * C

    # channel tile so each block's lane dim is a multiple of 128 (or the full array)
    t_nc = 128 // math.gcd(Wi, 128)
    if t_nc >= NC or (t_nc * Wo) % 128 != 0:
        t_nc = NC
    NCp = _round_up(NC, t_nc)

    # layout plumbing in XLA: (N, Hi, Wi, C) -> (Hi, NCp*Wi), channel-major within lanes
    xt = jnp.transpose(x_nhwc, (1, 0, 3, 2)).reshape(Hi, NC, Wi)
    if NCp != NC:
        xt = jnp.pad(xt, ((0, 0), (0, NCp - NC), (0, 0)))
    x2d = xt.reshape(Hi, NCp * Wi).astype(jnp.bfloat16)

    A = jnp.asarray(_interp_matrix(Ho, Hi))                                   # (Ho, Hi)
    Bt = _interp_matrix(Wo, Wi).T                                             # (Wi, Wo)
    Bblk = jnp.asarray(np.kron(np.eye(t_nc, dtype=np.float32), Bt))           # block-diag

    tr = 8 if (Ho % 8 == 0 and Ho >= 8) else Ho                               # >=2 row tiles

    out2d = pl.pallas_call(
        _bilinear_kernel,
        out_shape=jax.ShapeDtypeStruct((Ho, NCp * Wo), jnp.float32),
        grid=(Ho // tr, NCp // t_nc),
        in_specs=[
            pl.BlockSpec((tr, Hi), lambda r, c: (r, 0)),
            pl.BlockSpec((Hi, t_nc * Wi), lambda r, c: (0, c)),
            pl.BlockSpec((t_nc * Wi, t_nc * Wo), lambda r, c: (0, 0)),
        ],
        out_specs=pl.BlockSpec((tr, t_nc * Wo), lambda r, c: (r, c)),
        compiler_params=pltpu.CompilerParams(
            dimension_semantics=("parallel", "parallel")),
    )(A, x2d, Bblk)

    out = out2d.reshape(Ho, NCp, Wo)[:, :NC]
    return jnp.transpose(out, (1, 0, 2)).reshape(N, C, Ho, Wo)


# -----------------------------------------------------------------------------
# MultiTaskModel: backbone -> shared representation -> fused heads -> upsample.
# -----------------------------------------------------------------------------
def init_params(key, in_ch=4, mid_ch=16, feat_ch=32, num_classes=5):
    ks = jax.random.split(key, 6)

    def conv_init(k, cout, cin, kh, kw):
        fan_in = cin * kh * kw
        w = jax.random.normal(k, (cout, cin, kh, kw), jnp.float32) * np.sqrt(2.0 / fan_in)
        return w, jnp.zeros((cout,), jnp.float32)

    return {
        # TODO(synk): full ResNet/DCN backbone stands in as a two-conv stride-2 stack.
        "bb1": conv_init(ks[0], mid_ch, in_ch, 3, 3),
        "bb2": conv_init(ks[1], feat_ch, mid_ch, 3, 3),
        # TODO(synk): full ASPP (multi-rate dilated branches + global pooling) simplified
        #             to a 3x3 conv + ReLU followed by a 1x1 classifier per task.
        "seg1": conv_init(ks[2], feat_ch, feat_ch, 3, 3),
        "seg2": conv_init(ks[3], num_classes, feat_ch, 1, 1),
        "dep1": conv_init(ks[4], feat_ch, feat_ch, 3, 3),
        "dep2": conv_init(ks[5], 1, feat_ch, 1, 1),
    }


def prepare_params(params, tasks=("segment", "depth")):
    """One-time weight prep (hoisted out of the per-call path): tap-major bf16 conv weights,
    fused multi-task head (concatenated 3x3 convs + block-diagonal 1x1 classifier)."""

    def conv_prep(w, b):
        cout, cin, kh, kw = w.shape
        wt = jnp.transpose(w, (2, 3, 1, 0)).reshape(kh * kw, cin, cout)
        return wt.astype(jnp.bfloat16), b.reshape(1, cout).astype(jnp.float32)

    head_defs = [(t, k1, k2) for t, k1, k2 in
                 (("segment", "seg1", "seg2"), ("depth", "dep1", "dep2")) if t in tasks]
    assert head_defs, "at least one of ('segment', 'depth') must be requested"

    # fused 3x3 head conv: Cout = sum of per-task feature widths
    w1 = jnp.concatenate([params[k1][0] for _, k1, _ in head_defs], axis=0)
    b1 = jnp.concatenate([params[k1][1] for _, k1, _ in head_defs], axis=0)
    head_w, head_b = conv_prep(w1, b1)

    feat_sizes = [params[k1][0].shape[0] for _, k1, _ in head_defs]
    cls_sizes = [params[k2][0].shape[0] for _, _, k2 in head_defs]
    f_sum, c_sum = sum(feat_sizes), sum(cls_sizes)
    wcls = jnp.zeros((f_sum, c_sum), jnp.float32)
    bcls = jnp.zeros((c_sum,), jnp.float32)
    fo = co = 0
    for (_, _, k2), fs, cs in zip(head_defs, feat_sizes, cls_sizes):
        w2, b2 = params[k2]                                   # (cs, fs, 1, 1)
        wcls = wcls.at[fo:fo + fs, co:co + cs].set(w2[:, :, 0, 0].T)
        bcls = bcls.at[co:co + cs].set(b2)
        fo += fs
        co += cs

    bb1_w, bb1_b = conv_prep(*params["bb1"])
    bb2_w, bb2_b = conv_prep(*params["bb2"])
    prep = {
        "bb1_w": bb1_w, "bb1_b": bb1_b,
        "bb2_w": bb2_w, "bb2_b": bb2_b,
        "head_w": head_w, "head_b": head_b,
        "cls_w": wcls.astype(jnp.bfloat16), "cls_b": bcls.reshape(1, c_sum),
    }
    task_splits = tuple((t, c) for (t, _, _), c in zip(head_defs, cls_sizes))
    return prep, task_splits


def multi_task_forward(prep, x, *, task_splits):
    out_size = x.shape[2:]                                    # (H, W), as in PyTorch x.size()[2:]
    xh = jnp.transpose(x, (0, 2, 3, 1)).astype(jnp.bfloat16)  # NCHW -> NHWC once at the boundary

    # base_net(x) -> shared multi-scale representation; heads consume the last one.
    f1 = conv2d_nhwc(xh, prep["bb1_w"], prep["bb1_b"],
                     ksize=3, stride=2, pad=1, relu=True)     # (N, H/2, W/2, 16)
    f2 = conv2d_nhwc(f1, prep["bb2_w"], prep["bb2_b"],
                     ksize=3, stride=2, pad=1, relu=True)     # (N, H/4, W/4, 32)
    shared_representation = [f1, f2]
    feat = shared_representation[-1]

    # fused multi-task head: 3x3 conv + ReLU + block-diagonal 1x1 classifier in ONE kernel.
    logits = conv2d_nhwc(feat, prep["head_w"], prep["head_b"],
                         ksize=3, stride=1, pad=1, relu=True,
                         wcls=prep["cls_w"], bcls=prep["cls_b"],
                         out_dtype=jnp.bfloat16)              # (N, h, w, sum(Ct)) bf16

    up = bilinear_upsample_nchw(logits, out_size)             # (N, sum(Ct), H, W) f32

    outs, off = {}, 0
    for task, c in task_splits:
        outs[task] = up[:, off:off + c]
        off += c
    return outs


if __name__ == "__main__":
    key = jax.random.PRNGKey(0)
    pkey, xkey = jax.random.split(key)

    # small shapes: batch=2, channels=4, spatial=16x16
    x = jax.random.normal(xkey, (2, 4, 16, 16), jnp.float32)
    params = init_params(pkey, in_ch=4, mid_ch=16, feat_ch=32, num_classes=5)
    prep, task_splits = prepare_params(params, tasks=("segment", "depth"))

    fwd = jax.jit(functools.partial(multi_task_forward, task_splits=task_splits))
    outs = fwd(prep, x)
    outs = jax.tree_util.tree_map(jax.block_until_ready, outs)

    assert outs["segment"].shape == (2, 5, 16, 16), outs["segment"].shape
    assert outs["depth"].shape == (2, 1, 16, 16), outs["depth"].shape
    assert all(bool(jnp.isfinite(v).all()) for v in outs.values())
    print("KERNEL_OK")
</pallas_src>

<mosaic_0001>
module attributes {stable_mosaic.version = 11 : i64} {
  func.func @_conv_tap_kernel(%arg0: i32, %arg1: memref<1x4x9x9x4xbf16, #tpu.memory_space<vmem>>, %arg2: memref<9x4x16xbf16, #tpu.memory_space<vmem>>, %arg3: memref<1x16xf32, #tpu.memory_space<vmem>>, %arg4: memref<1x8x8x16xbf16, #tpu.memory_space<vmem>>) attributes {dimension_semantics = [#tpu.dimension_semantics<parallel>], iteration_bounds = array<i64: 2>, scalar_prefetch = 0 : i64, scratch_operands = 0 : i64, tpu.core_type = #tpu.core_type<tc>, window_params = [{transform_indices = @transform_0, window_bounds = array<i64: 1, 4, 9, 9, 4>}, {pipeline_mode = #tpu.pipeline_mode<synchronous>, transform_indices = @transform_1, window_bounds = array<i64: 9, 4, 16>}, {pipeline_mode = #tpu.pipeline_mode<synchronous>, transform_indices = @transform_2, window_bounds = array<i64: 1, 16>}, {transform_indices = @transform_3, window_bounds = array<i64: 1, 8, 8, 16>}]} {
    %cst = arith.constant 0.000000e+00 : f32
    %0 = vector.broadcast %cst : f32 to vector<64x16xf32>
    %c0 = arith.constant 0 : index
    %c0_0 = arith.constant 0 : index
    %c0_1 = arith.constant 0 : index
    %c0_2 = arith.constant 0 : index
    %c0_3 = arith.constant 0 : index
    %1 = vector.load %arg1[%c0, %c0_0, %c0_1, %c0_2, %c0_3] : memref<1x4x9x9x4xbf16, #tpu.memory_space<vmem>>, vector<1x1x8x8x4xbf16>
    %2 = vector.shape_cast %1 : vector<1x1x8x8x4xbf16> to vector<8x8x4xbf16>
    %3 = vector.shape_cast %2 : vector<8x8x4xbf16> to vector<64x4xbf16>
    %c0_4 = arith.constant 0 : index
    %c0_5 = arith.constant 0 : index
    %c0_6 = arith.constant 0 : index
    %4 = vector.load %arg2[%c0_4, %c0_5, %c0_6] : memref<9x4x16xbf16, #tpu.memory_space<vmem>>, vector<1x4x16xbf16>
    %5 = vector.shape_cast %4 : vector<1x4x16xbf16> to vector<4x16xbf16>
    %cst_7 = arith.constant dense<0.000000e+00> : vector<64x16xf32>
    %6 = tpu.matmul %3, %5, %cst_7 {dimension_numbers = #tpu.dot_dimension_numbers<[1], [0], [0], [1], [0, 0, 1, 1], [], []>} : vector<64x4xbf16>, vector<4x16xbf16>, vector<64x16xf32> -> vector<64x16xf32>
    %7 = arith.addf %0, %6 : vector<64x16xf32>
    %c0_8 = arith.constant 0 : index
    %c1 = arith.constant 1 : index
    %c0_9 = arith.constant 0 : index
    %c0_10 = arith.constant 0 : index
    %c0_11 = arith.constant 0 : index
    %8 = vector.load %arg1[%c0_8, %c1, %c0_9, %c0_10, %c0_11] : memref<1x4x9x9x4xbf16, #tpu.memory_space<vmem>>, vector<1x1x8x8x4xbf16>
    %9 = vector.shape_cast %8 : vector<1x1x8x8x4xbf16> to vector<8x8x4xbf16>
    %10 = vector.shape_cast %9 : vector<8x8x4xbf16> to vector<64x4xbf16>
    %c1_12 = arith.constant 1 : index
    %c0_13 = arith.constant 0 : index
    %c0_14 = arith.constant 0 : index
    %11 = vector.load %arg2[%c1_12, %c0_13, %c0_14] : memref<9x4x16xbf16, #tpu.memory_space<vmem>>, vector<1x4x16xbf16>
    %12 = vector.shape_cast %11 : vector<1x4x16xbf16> to vector<4x16xbf16>
    %cst_15 = arith.constant dense<0.000000e+00> : vector<64x16xf32>
    %13 = tpu.matmul %10, %12, %cst_15 {dimension_numbers = #tpu.dot_dimension_numbers<[1], [0], [0], [1], [0, 0, 1, 1], [], []>} : vector<64x4xbf16>, vector<4x16xbf16>, vector<64x16xf32> -> vector<64x16xf32>
    %14 = arith.addf %7, %13 : vector<64x16xf32>
    %c0_16 = arith.constant 0 : index
    %c0_17 = arith.constant 0 : index
    %c0_18 = arith.constant 0 : index
    %c1_19 = arith.constant 1 : index
    %c0_20 = arith.constant 0 : index
    %15 = vector.load %arg1[%c0_16, %c0_17, %c0_18, %c1_19, %c0_20] : memref<1x4x9x9x4xbf16, #tpu.memory_space<vmem>>, vector<1x1x8x8x4xbf16>
    %16 = vector.shape_cast %15 : vector<1x1x8x8x4xbf16> to vector<8x8x4xbf16>
    %17 = vector.shape_cast %16 : vector<8x8x4xbf16> to vector<64x4xbf16>
    %c2 = arith.constant 2 : index
    %c0_21 = arith.constant 0 : index
    %c0_22 = arith.constant 0 : index
    %18 = vector.load %arg2[%c2, %c0_21, %c0_22] : memref<9x4x16xbf16, #tpu.memory_space<vmem>>, vector<1x4x16xbf16>
    %19 = vector.shape_cast %18 : vector<1x4x16xbf16> to vector<4x16xbf16>
    %cst_23 = arith.constant dense<0.000000e+00> : vector<64x16xf32>
    %20 = tpu.matmul %17, %19, %cst_23 {dimension_numbers = #tpu.dot_dimension_numbers<[1], [0], [0], [1], [0, 0, 1, 1], [], []>} : vector<64x4xbf16>, vector<4x16xbf16>, vector<64x16xf32> -> vector<64x16xf32>
    %21 = arith.addf %14, %20 : vector<64x16xf32>
    %c0_24 = arith.constant 0 : index
    %c2_25 = arith.constant 2 : index
    %c0_26 = arith.constant 0 : index
    %c0_27 = arith.constant 0 : index
    %c0_28 = arith.constant 0 : index
    %22 = vector.load %arg1[%c0_24, %c2_25, %c0_26, %c0_27, %c0_28] : memref<1x4x9x9x4xbf16, #tpu.memory_space<vmem>>, vector<1x1x8x8x4xbf16>
    %23 = vector.shape_cast %22 : vector<1x1x8x8x4xbf16> to vector<8x8x4xbf16>
    %24 = vector.shape_cast %23 : vector<8x8x4xbf16> to vector<64x4xbf16>
    %c3 = arith.constant 3 : index
    %c0_29 = arith.constant 0 : index
    %c0_30 = arith.constant 0 : index
    %25 = vector.load %arg2[%c3, %c0_29, %c0_30] : memref<9x4x16xbf16, #tpu.memory_space<vmem>>, vector<1x4x16xbf16>
    %26 = vector.shape_cast %25 : vector<1x4x16xbf16> to vector<4x16xbf16>
    %cst_31 = arith.constant dense<0.000000e+00> : vector<64x16xf32>
    %27 = tpu.matmul %24, %26, %cst_31 {dimension_numbers = #tpu.dot_dimension_numbers<[1], [0], [0], [1], [0, 0, 1, 1], [], []>} : vector<64x4xbf16>, vector<4x16xbf16>, vector<64x16xf32> -> vector<64x16xf32>
    %28 = arith.addf %21, %27 : vector<64x16xf32>
    %c0_32 = arith.constant 0 : index
    %c3_33 = arith.constant 3 : index
    %c0_34 = arith.constant 0 : index
    %c0_35 = arith.constant 0 : index
    %c0_36 = arith.constant 0 : index
    %29 = vector.load %arg1[%c0_32, %c3_33, %c0_34, %c0_35, %c0_36] : memref<1x4x9x9x4xbf16, #tpu.memory_space<vmem>>, vector<1x1x8x8x4xbf16>
    %30 = vector.shape_cast %29 : vector<1x1x8x8x4xbf16> to vector<8x8x4xbf16>
    %31 = vector.shape_cast %30 : vector<8x8x4xbf16> to vector<64x4xbf16>
    %c4 = arith.constant 4 : index
    %c0_37 = arith.constant 0 : index
    %c0_38 = arith.constant 0 : index
    %32 = vector.load %arg2[%c4, %c0_37, %c0_38] : memref<9x4x16xbf16, #tpu.memory_space<vmem>>, vector<1x4x16xbf16>
    %33 = vector.shape_cast %32 : vector<1x4x16xbf16> to vector<4x16xbf16>
    %cst_39 = arith.constant dense<0.000000e+00> : vector<64x16xf32>
    %34 = tpu.matmul %31, %33, %cst_39 {dimension_numbers = #tpu.dot_dimension_numbers<[1], [0], [0], [1], [0, 0, 1, 1], [], []>} : vector<64x4xbf16>, vector<4x16xbf16>, vector<64x16xf32> -> vector<64x16xf32>
    %35 = arith.addf %28, %34 : vector<64x16xf32>
    %c0_40 = arith.constant 0 : index
    %c2_41 = arith.constant 2 : index
    %c0_42 = arith.constant 0 : index
    %c1_43 = arith.constant 1 : index
    %c0_44 = arith.constant 0 : index
    %36 = vector.load %arg1[%c0_40, %c2_41, %c0_42, %c1_43, %c0_44] : memref<1x4x9x9x4xbf16, #tpu.memory_space<vmem>>, vector<1x1x8x8x4xbf16>
    %37 = vector.shape_cast %36 : vector<1x1x8x8x4xbf16> to vector<8x8x4xbf16>
    %38 = vector.shape_cast %37 : vector<8x8x4xbf16> to vector<64x4xbf16>
    %c5 = arith.constant 5 : index
    %c0_45 = arith.constant 0 : index
    %c0_46 = arith.constant 0 : index
    %39 = vector.load %arg2[%c5, %c0_45, %c0_46] : memref<9x4x16xbf16, #tpu.memory_space<vmem>>, vector<1x4x16xbf16>
    %40 = vector.shape_cast %39 : vector<1x4x16xbf16> to vector<4x16xbf16>
    %cst_47 = arith.constant dense<0.000000e+00> : vector<64x16xf32>
    %41 = tpu.matmul %38, %40, %cst_47 {dimension_numbers = #tpu.dot_dimension_numbers<[1], [0], [0], [1], [0, 0, 1, 1], [], []>} : vector<64x4xbf16>, vector<4x16xbf16>, vector<64x16xf32> -> vector<64x16xf32>
    %42 = arith.addf %35, %41 : vector<64x16xf32>
    %c0_48 = arith.constant 0 : index
    %c0_49 = arith.constant 0 : index
    %c1_50 = arith.constant 1 : index
    %c0_51 = arith.constant 0 : index
    %c0_52 = arith.constant 0 : index
    %43 = vector.load %arg1[%c0_48, %c0_49, %c1_50, %c0_51, %c0_52] : memref<1x4x9x9x4xbf16, #tpu.memory_space<vmem>>, vector<1x1x8x8x4xbf16>
    %44 = vector.shape_cast %43 : vector<1x1x8x8x4xbf16> to vector<8x8x4xbf16>
    %45 = vector.shape_cast %44 : vector<8x8x4xbf16> to vector<64x4xbf16>
    %c6 = arith.constant 6 : index
    %c0_53 = arith.constant 0 : index
    %c0_54 = arith.constant 0 : index
    %46 = vector.load %arg2[%c6, %c0_53, %c0_54] : memref<9x4x16xbf16, #tpu.memory_space<vmem>>, vector<1x4x16xbf16>
    %47 = vector.shape_cast %46 : vector<1x4x16xbf16> to vector<4x16xbf16>
    %cst_55 = arith.constant dense<0.000000e+00> : vector<64x16xf32>
    %48 = tpu.matmul %45, %47, %cst_55 {dimension_numbers = #tpu.dot_dimension_numbers<[1], [0], [0], [1], [0, 0, 1, 1], [], []>} : vector<64x4xbf16>, vector<4x16xbf16>, vector<64x16xf32> -> vector<64x16xf32>
    %49 = arith.addf %42, %48 : vector<64x16xf32>
    %c0_56 = arith.constant 0 : index
    %c1_57 = arith.constant 1 : index
    %c1_58 = arith.constant 1 : index
    %c0_59 = arith.constant 0 : index
    %c0_60 = arith.constant 0 : index
    %50 = vector.load %arg1[%c0_56, %c1_57, %c1_58, %c0_59, %c0_60] : memref<1x4x9x9x4xbf16, #tpu.memory_space<vmem>>, vector<1x1x8x8x4xbf16>
    %51 = vector.shape_cast %50 : vector<1x1x8x8x4xbf16> to vector<8x8x4xbf16>
    %52 = vector.shape_cast %51 : vector<8x8x4xbf16> to vector<64x4xbf16>
    %c7 = arith.constant 7 : index
    %c0_61 = arith.constant 0 : index
    %c0_62 = arith.constant 0 : index
    %53 = vector.load %arg2[%c7, %c0_61, %c0_62] : memref<9x4x16xbf16, #tpu.memory_space<vmem>>, vector<1x4x16xbf16>
    %54 = vector.shape_cast %53 : vector<1x4x16xbf16> to vector<4x16xbf16>
    %cst_63 = arith.constant dense<0.000000e+00> : vector<64x16xf32>
    %55 = tpu.matmul %52, %54, %cst_63 {dimension_numbers = #tpu.dot_dimension_numbers<[1], [0], [0], [1], [0, 0, 1, 1], [], []>} : vector<64x4xbf16>, vector<4x16xbf16>, vector<64x16xf32> -> vector<64x16xf32>
    %56 = arith.addf %49, %55 : vector<64x16xf32>
    %c0_64 = arith.constant 0 : index
    %c0_65 = arith.constant 0 : index
    %c1_66 = arith.constant 1 : index
    %c1_67 = arith.constant 1 : index
    %c0_68 = arith.constant 0 : index
    %57 = vector.load %arg1[%c0_64, %c0_65, %c1_66, %c1_67, %c0_68] : memref<1x4x9x9x4xbf16, #tpu.memory_space<vmem>>, vector<1x1x8x8x4xbf16>
    %58 = vector.shape_cast %57 : vector<1x1x8x8x4xbf16> to vector<8x8x4xbf16>
    %59 = vector.shape_cast %58 : vector<8x8x4xbf16> to vector<64x4xbf16>
    %c8 = arith.constant 8 : index
    %c0_69 = arith.constant 0 : index
    %c0_70 = arith.constant 0 : index
    %60 = vector.load %arg2[%c8, %c0_69, %c0_70] : memref<9x4x16xbf16, #tpu.memory_space<vmem>>, vector<1x4x16xbf16>
    %61 = vector.shape_cast %60 : vector<1x4x16xbf16> to vector<4x16xbf16>
    %cst_71 = arith.constant dense<0.000000e+00> : vector<64x16xf32>
    %62 = tpu.matmul %59, %61, %cst_71 {dimension_numbers = #tpu.dot_dimension_numbers<[1], [0], [0], [1], [0, 0, 1, 1], [], []>} : vector<64x4xbf16>, vector<4x16xbf16>, vector<64x16xf32> -> vector<64x16xf32>
    %63 = arith.addf %56, %62 : vector<64x16xf32>
    %c0_72 = arith.constant 0 : index
    %c0_73 = arith.constant 0 : index
    %64 = vector.load %arg3[%c0_72, %c0_73] : memref<1x16xf32, #tpu.memory_space<vmem>>, vector<1x16xf32>
    %65 = vector.broadcast %64 : vector<1x16xf32> to vector<64x16xf32>
    %66 = arith.addf %63, %65 : vector<64x16xf32>
    %cst_74 = arith.constant 0.000000e+00 : f32
    %67 = vector.broadcast %cst_74 : f32 to vector<64x16xf32>
    %68 = arith.maximumf %66, %67 : vector<64x16xf32>
    %69 = vector.shape_cast %68 : vector<64x16xf32> to vector<8x8x16xf32>
    %70 = arith.truncf %69 : vector<8x8x16xf32> to vector<8x8x16xbf16>
    %c0_75 = arith.constant 0 : index
    %c0_76 = arith.constant 0 : index
    %c0_77 = arith.constant 0 : index
    %c0_78 = arith.constant 0 : index
    %71 = vector.load %arg4[%c0_75, %c0_76, %c0_77, %c0_78] : memref<1x8x8x16xbf16, #tpu.memory_space<vmem>>, vector<1x8x8x16xbf16>
    %72 = vector.shape_cast %71 : vector<1x8x8x16xbf16> to vector<8x8x16xbf16>
    %73 = vector.shape_cast %70 : vector<8x8x16xbf16> to vector<1x8x8x16xbf16>
    tpu.vector_store %arg4[%c0_75, %c0_76, %c0_77, %c0_78], %73 {strides = array<i32>} : memref<1x8x8x16xbf16, #tpu.memory_space<vmem>>, vector<1x8x8x16xbf16>,
    return
  }
  func.func @transform_0(%arg0: i32) -> (i32, i32, i32, i32, i32) {
    %c0_i32 = arith.constant 0 : i32
    %c0_i32_0 = arith.constant 0 : i32
    %c0_i32_1 = arith.constant 0 : i32
    %c0_i32_2 = arith.constant 0 : i32
    %c0_i32_3 = arith.constant 0 : i32
    return %arg0, %c0_i32, %c0_i32_0, %c0_i32_1, %c0_i32_2 : i32, i32, i32, i32, i32
  }
  func.func @transform_1(%arg0: i32) -> (i32, i32, i32) {
    %c0_i32 = arith.constant 0 : i32
    %c0_i32_0 = arith.constant 0 : i32
    %c0_i32_1 = arith.constant 0 : i32
    %c0_i32_2 = arith.constant 0 : i32
    return %c0_i32, %c0_i32_0, %c0_i32_1 : i32, i32, i32
  }
  func.func @transform_2(%arg0: i32) -> (i32, i32) {
    %c0_i32 = arith.constant 0 : i32
    %c0_i32_0 = arith.constant 0 : i32
    %c0_i32_1 = arith.constant 0 : i32
    return %c0_i32, %c0_i32_0 : i32, i32
  }
  func.func @transform_3(%arg0: i32) -> (i32, i32, i32, i32) {
    %c0_i32 = arith.constant 0 : i32
    %c0_i32_0 = arith.constant 0 : i32
    %c0_i32_1 = arith.constant 0 : i32
    %c0_i32_2 = arith.constant 0 : i32
    return %arg0, %c0_i32, %c0_i32_0, %c0_i32_1 : i32, i32, i32, i32
  }
}

module attributes {stable_mosaic.version = 11 : i64} {
  func.func @_conv_tap_kernel(%arg0: i32, %arg1: memref<1x1x6x10x32xbf16, #tpu.memory_space<vmem>>, %arg2: memref<9x32x64xbf16, #tpu.memory_space<vmem>>, %arg3: memref<1x64xf32, #tpu.memory_space<vmem>>, %arg4: memref<64x6xbf16, #tpu.memory_space<vmem>>, %arg5: memref<1x6xf32, #tpu.memory_space<vmem>>, %arg6: memref<1x4x8x6xbf16, #tpu.memory_space<vmem>>) attributes {dimension_semantics = [#tpu.dimension_semantics<parallel>], iteration_bounds = array<i64: 2>, scalar_prefetch = 0 : i64, scratch_operands = 0 : i64, tpu.core_type = #tpu.core_type<tc>, window_params = [{transform_indices = @transform_0, window_bounds = array<i64: 1, 1, 6, 10, 32>}, {pipeline_mode = #tpu.pipeline_mode<synchronous>, transform_indices = @transform_1, window_bounds = array<i64: 9, 32, 64>}, {pipeline_mode = #tpu.pipeline_mode<synchronous>, transform_indices = @transform_2, window_bounds = array<i64: 1, 64>}, {pipeline_mode = #tpu.pipeline_mode<synchronous>, transform_indices = @transform_3, window_bounds = array<i64: 64, 6>}, {pipeline_mode = #tpu.pipeline_mode<synchronous>, transform_indices = @transform_4, window_bounds = array<i64: 1, 6>}, {transform_indices = @transform_5, window_bounds = array<i64: 1, 4, 8, 6>}]} {
    %cst = arith.constant 0.000000e+00 : f32
    %0 = vector.broadcast %cst : f32 to vector<32x64xf32>
    %c0 = arith.constant 0 : index
    %c0_0 = arith.constant 0 : index
    %c0_1 = arith.constant 0 : index
    %c0_2 = arith.constant 0 : index
    %c0_3 = arith.constant 0 : index
    %1 = vector.load %arg1[%c0, %c0_0, %c0_1, %c0_2, %c0_3] : memref<1x1x6x10x32xbf16, #tpu.memory_space<vmem>>, vector<1x1x4x8x32xbf16>
    %2 = vector.shape_cast %1 : vector<1x1x4x8x32xbf16> to vector<4x8x32xbf16>
    %3 = vector.shape_cast %2 : vector<4x8x32xbf16> to vector<32x32xbf16>
    %c0_4 = arith.constant 0 : index
    %c0_5 = arith.constant 0 : index
    %c0_6 = arith.constant 0 : index
    %4 = vector.load %arg2[%c0_4, %c0_5, %c0_6] : memref<9x32x64xbf16, #tpu.memory_space<vmem>>, vector<1x32x64xbf16>
    %5 = vector.shape_cast %4 : vector<1x32x64xbf16> to vector<32x64xbf16>
    %cst_7 = arith.constant dense<0.000000e+00> : vector<32x64xf32>
    %6 = tpu.matmul %3, %5, %cst_7 {dimension_numbers = #tpu.dot_dimension_numbers<[1], [0], [0], [1], [0, 0, 1, 1], [], []>} : vector<32x32xbf16>, vector<32x64xbf16>, vector<32x64xf32> -> vector<32x64xf32>
    %7 = arith.addf %0, %6 : vector<32x64xf32>
    %c0_8 = arith.constant 0 : index
    %c0_9 = arith.constant 0 : index
    %c0_10 = arith.constant 0 : index
    %c1 = arith.constant 1 : index
    %c0_11 = arith.constant 0 : index
    %8 = vector.load %arg1[%c0_8, %c0_9, %c0_10, %c1, %c0_11] : memref<1x1x6x10x32xbf16, #tpu.memory_space<vmem>>, vector<1x1x4x8x32xbf16>
    %9 = vector.shape_cast %8 : vector<1x1x4x8x32xbf16> to vector<4x8x32xbf16>
    %10 = vector.shape_cast %9 : vector<4x8x32xbf16> to vector<32x32xbf16>
    %c1_12 = arith.constant 1 : index
    %c0_13 = arith.constant 0 : index
    %c0_14 = arith.constant 0 : index
    %11 = vector.load %arg2[%c1_12, %c0_13, %c0_14] : memref<9x32x64xbf16, #tpu.memory_space<vmem>>, vector<1x32x64xbf16>
    %12 = vector.shape_cast %11 : vector<1x32x64xbf16> to vector<32x64xbf16>
    %cst_15 = arith.constant dense<0.000000e+00> : vector<32x64xf32>
    %13 = tpu.matmul %10, %12, %cst_15 {dimension_numbers = #tpu.dot_dimension_numbers<[1], [0], [0], [1], [0, 0, 1, 1], [], []>} : vector<32x32xbf16>, vector<32x64xbf16>, vector<32x64xf32> -> vector<32x64xf32>
    %14 = arith.addf %7, %13 : vector<32x64xf32>
    %c0_16 = arith.constant 0 : index
    %c0_17 = arith.constant 0 : index
    %c0_18 = arith.constant 0 : index
    %c2 = arith.constant 2 : index
    %c0_19 = arith.constant 0 : index
    %15 = vector.load %arg1[%c0_16, %c0_17, %c0_18, %c2, %c0_19] : memref<1x1x6x10x32xbf16, #tpu.memory_space<vmem>>, vector<1x1x4x8x32xbf16>
    %16 = vector.shape_cast %15 : vector<1x1x4x8x32xbf16> to vector<4x8x32xbf16>
    %17 = vector.shape_cast %16 : vector<4x8x32xbf16> to vector<32x32xbf16>
    %c2_20 = arith.constant 2 : index
    %c0_21 = arith.constant 0 : index
    %c0_22 = arith.constant 0 : index
    %18 = vector.load %arg2[%c2_20, %c0_21, %c0_22] : memref<9x32x64xbf16, #tpu.memory_space<vmem>>, vector<1x32x64xbf16>
    %19 = vector.shape_cast %18 : vector<1x32x64xbf16> to vector<32x64xbf16>
    %cst_23 = arith.constant dense<0.000000e+00> : vector<32x64xf32>
    %20 = tpu.matmul %17, %19, %cst_23 {dimension_numbers = #tpu.dot_dimension_numbers<[1], [0], [0], [1], [0, 0, 1, 1], [], []>} : vector<32x32xbf16>, vector<32x64xbf16>, vector<32x64xf32> -> vector<32x64xf32>
    %21 = arith.addf %14, %20 : vector<32x64xf32>
    %c0_24 = arith.constant 0 : index
    %c0_25 = arith.constant 0 : index
    %c1_26 = arith.constant 1 : index
    %c0_27 = arith.constant 0 : index
    %c0_28 = arith.constant 0 : index
    %22 = vector.load %arg1[%c0_24, %c0_25, %c1_26, %c0_27, %c0_28] : memref<1x1x6x10x32xbf16, #tpu.memory_space<vmem>>, vector<1x1x4x8x32xbf16>
    %23 = vector.shape_cast %22 : vector<1x1x4x8x32xbf16> to vector<4x8x32xbf16>
    %24 = vector.shape_cast %23 : vector<4x8x32xbf16> to vector<32x32xbf16>
    %c3 = arith.constant 3 : index
    %c0_29 = arith.constant 0 : index
    %c0_30 = arith.constant 0 : index
    %25 = vector.load %arg2[%c3, %c0_29, %c0_30] : memref<9x32x64xbf16, #tpu.memory_space<vmem>>, vector<1x32x64xbf16>
    %26 = vector.shape_cast %25 : vector<1x32x64xbf16> to vector<32x64xbf16>
    %cst_31 = arith.constant dense<0.000000e+00> : vector<32x64xf32>
    %27 = tpu.matmul %24, %26, %cst_31 {dimension_numbers = #tpu.dot_dimension_numbers<[1], [0], [0], [1], [0, 0, 1, 1], [], []>} : vector<32x32xbf16>, vector<32x64xbf16>, vector<32x64xf32> -> vector<32x64xf32>
    %28 = arith.addf %21, %27 : vector<32x64xf32>
    %c0_32 = arith.constant 0 : index
    %c0_33 = arith.constant 0 : index
    %c1_34 = arith.constant 1 : index
    %c1_35 = arith.constant 1 : index
    %c0_36 = arith.constant 0 : index
    %29 = vector.load %arg1[%c0_32, %c0_33, %c1_34, %c1_35, %c0_36] : memref<1x1x6x10x32xbf16, #tpu.memory_space<vmem>>, vector<1x1x4x8x32xbf16>
    %30 = vector.shape_cast %29 : vector<1x1x4x8x32xbf16> to vector<4x8x32xbf16>
    %31 = vector.shape_cast %30 : vector<4x8x32xbf16> to vector<32x32xbf16>
    %c4 = arith.constant 4 : index
    %c0_37 = arith.constant 0 : index
    %c0_38 = arith.constant 0 : index
    %32 = vector.load %arg2[%c4, %c0_37, %c0_38] : memref<9x32x64xbf16, #tpu.memory_space<vmem>>, vector<1x32x64xbf16>
    %33 = vector.shape_cast %32 : vector<1x32x64xbf16> to vector<32x64xbf16>
    %cst_39 = arith.constant dense<0.000000e+00> : vector<32x64xf32>
    %34 = tpu.matmul %31, %33, %cst_39 {dimension_numbers = #tpu.dot_dimension_numbers<[1], [0], [0], [1], [0, 0, 1, 1], [], []>} : vector<32x32xbf16>, vector<32x64xbf16>, vector<32x64xf32> -> vector<32x64xf32>
    %35 = arith.addf %28, %34 : vector<32x64xf32>
    %c0_40 = arith.constant 0 : index
    %c0_41 = arith.constant 0 : index
    %c1_42 = arith.constant 1 : index
    %c2_43 = arith.constant 2 : index
    %c0_44 = arith.constant 0 : index
    %36 = vector.load %arg1[%c0_40, %c0_41, %c1_42, %c2_43, %c0_44] : memref<1x1x6x10x32xbf16, #tpu.memory_space<vmem>>, vector<1x1x4x8x32xbf16>
    %37 = vector.shape_cast %36 : vector<1x1x4x8x32xbf16> to vector<4x8x32xbf16>
    %38 = vector.shape_cast %37 : vector<4x8x32xbf16> to vector<32x32xbf16>
    %c5 = arith.constant 5 : index
    %c0_45 = arith.constant 0 : index
    %c0_46 = arith.constant 0 : index
    %39 = vector.load %arg2[%c5, %c0_45, %c0_46] : memref<9x32x64xbf16, #tpu.memory_space<vmem>>, vector<1x32x64xbf16>
    %40 = vector.shape_cast %39 : vector<1x32x64xbf16> to vector<32x64xbf16>
    %cst_47 = arith.constant dense<0.000000e+00> : vector<32x64xf32>
    %41 = tpu.matmul %38, %40, %cst_47 {dimension_numbers = #tpu.dot_dimension_numbers<[1], [0], [0], [1], [0, 0, 1, 1], [], []>} : vector<32x32xbf16>, vector<32x64xbf16>, vector<32x64xf32> -> vector<32x64xf32>
    %42 = arith.addf %35, %41 : vector<32x64xf32>
    %c0_48 = arith.constant 0 : index
    %c0_49 = arith.constant 0 : index
    %c2_50 = arith.constant 2 : index
    %c0_51 = arith.constant 0 : index
    %c0_52 = arith.constant 0 : index
    %43 = vector.load %arg1[%c0_48, %c0_49, %c2_50, %c0_51, %c0_52] : memref<1x1x6x10x32xbf16, #tpu.memory_space<vmem>>, vector<1x1x4x8x32xbf16>
    %44 = vector.shape_cast %43 : vector<1x1x4x8x32xbf16> to vector<4x8x32xbf16>
    %45 = vector.shape_cast %44 : vector<4x8x32xbf16> to vector<32x32xbf16>
    %c6 = arith.constant 6 : index
    %c0_53 = arith.constant 0 : index
    %c0_54 = arith.constant 0 : index
    %46 = vector.load %arg2[%c6, %c0_53, %c0_54] : memref<9x32x64xbf16, #tpu.memory_space<vmem>>, vector<1x32x64xbf16>
    %47 = vector.shape_cast %46 : vector<1x32x64xbf16> to vector<32x64xbf16>
    %cst_55 = arith.constant dense<0.000000e+00> : vector<32x64xf32>
    %48 = tpu.matmul %45, %47, %cst_55 {dimension_numbers = #tpu.dot_dimension_numbers<[1], [0], [0], [1], [0, 0, 1, 1], [], []>} : vector<32x32xbf16>, vector<32x64xbf16>, vector<32x64xf32> -> vector<32x64xf32>
    %49 = arith.addf %42, %48 : vector<32x64xf32>
    %c0_56 = arith.constant 0 : index
    %c0_57 = arith.constant 0 : index
    %c2_58 = arith.constant 2 : index
    %c1_59 = arith.constant 1 : index
    %c0_60 = arith.constant 0 : index
    %50 = vector.load %arg1[%c0_56, %c0_57, %c2_58, %c1_59, %c0_60] : memref<1x1x6x10x32xbf16, #tpu.memory_space<vmem>>, vector<1x1x4x8x32xbf16>
    %51 = vector.shape_cast %50 : vector<1x1x4x8x32xbf16> to vector<4x8x32xbf16>
    %52 = vector.shape_cast %51 : vector<4x8x32xbf16> to vector<32x32xbf16>
    %c7 = arith.constant 7 : index
    %c0_61 = arith.constant 0 : index
    %c0_62 = arith.constant 0 : index
    %53 = vector.load %arg2[%c7, %c0_61, %c0_62] : memref<9x32x64xbf16, #tpu.memory_space<vmem>>, vector<1x32x64xbf16>
    %54 = vector.shape_cast %53 : vector<1x32x64xbf16> to vector<32x64xbf16>
    %cst_63 = arith.constant dense<0.000000e+00> : vector<32x64xf32>
    %55 = tpu.matmul %52, %54, %cst_63 {dimension_numbers = #tpu.dot_dimension_numbers<[1], [0], [0], [1], [0, 0, 1, 1], [], []>} : vector<32x32xbf16>, vector<32x64xbf16>, vector<32x64xf32> -> vector<32x64xf32>
    %56 = arith.addf %49, %55 : vector<32x64xf32>
    %c0_64 = arith.constant 0 : index
    %c0_65 = arith.constant 0 : index
    %c2_66 = arith.constant 2 : index
    %c2_67 = arith.constant 2 : index
    %c0_68 = arith.constant 0 : index
    %57 = vector.load %arg1[%c0_64, %c0_65, %c2_66, %c2_67, %c0_68] : memref<1x1x6x10x32xbf16, #tpu.memory_space<vmem>>, vector<1x1x4x8x32xbf16>
    %58 = vector.shape_cast %57 : vector<1x1x4x8x32xbf16> to vector<4x8x32xbf16>
    %59 = vector.shape_cast %58 : vector<4x8x32xbf16> to vector<32x32xbf16>
    %c8 = arith.constant 8 : index
    %c0_69 = arith.constant 0 : index
    %c0_70 = arith.constant 0 : index
    %60 = vector.load %arg2[%c8, %c0_69, %c0_70] : memref<9x32x64xbf16, #tpu.memory_space<vmem>>, vector<1x32x64xbf16>
    %61 = vector.shape_cast %60 : vector<1x32x64xbf16> to vector<32x64xbf16>
    %cst_71 = arith.constant dense<0.000000e+00> : vector<32x64xf32>
    %62 = tpu.matmul %59, %61, %cst_71 {dimension_numbers = #tpu.dot_dimension_numbers<[1], [0], [0], [1], [0, 0, 1, 1], [], []>} : vector<32x32xbf16>, vector<32x64xbf16>, vector<32x64xf32> -> vector<32x64xf32>
    %63 = arith.addf %56, %62 : vector<32x64xf32>
    %c0_72 = arith.constant 0 : index
    %c0_73 = arith.constant 0 : index
    %64 = vector.load %arg3[%c0_72, %c0_73] : memref<1x64xf32, #tpu.memory_space<vmem>>, vector<1x64xf32>
    %65 = vector.broadcast %64 : vector<1x64xf32> to vector<32x64xf32>
    %66 = arith.addf %63, %65 : vector<32x64xf32>
    %cst_74 = arith.constant 0.000000e+00 : f32
    %67 = vector.broadcast %cst_74 : f32 to vector<32x64xf32>
    %68 = arith.maximumf %66, %67 : vector<32x64xf32>
    %69 = arith.truncf %68 : vector<32x64xf32> to vector<32x64xbf16>
    %c0_75 = arith.constant 0 : index
    %c0_76 = arith.constant 0 : index
    %70 = vector.load %arg4[%c0_75, %c0_76] : memref<64x6xbf16, #tpu.memory_space<vmem>>, vector<64x6xbf16>
    %cst_77 = arith.constant dense<0.000000e+00> : vector<32x6xf32>
    %71 = tpu.matmul %69, %70, %cst_77 {dimension_numbers = #tpu.dot_dimension_numbers<[1], [0], [0], [1], [0, 0, 1, 1], [], []>} : vector<32x64xbf16>, vector<64x6xbf16>, vector<32x6xf32> -> vector<32x6xf32>
    %c0_78 = arith.constant 0 : index
    %c0_79 = arith.constant 0 : index
    %72 = vector.load %arg5[%c0_78, %c0_79] : memref<1x6xf32, #tpu.memory_space<vmem>>, vector<1x6xf32>
    %73 = vector.broadcast %72 : vector<1x6xf32> to vector<32x6xf32>
    %74 = arith.addf %71, %73 : vector<32x6xf32>
    %75 = vector.shape_cast %74 : vector<32x6xf32> to vector<4x8x6xf32>
    %76 = arith.truncf %75 : vector<4x8x6xf32> to vector<4x8x6xbf16>
    %c0_80 = arith.constant 0 : index
    %c0_81 = arith.constant 0 : index
    %c0_82 = arith.constant 0 : index
    %c0_83 = arith.constant 0 : index
    %77 = vector.load %arg6[%c0_80, %c0_81, %c0_82, %c0_83] : memref<1x4x8x6xbf16, #tpu.memory_space<vmem>>, vector<1x4x8x6xbf16>
    %78 = vector.shape_cast %77 : vector<1x4x8x6xbf16> to vector<4x8x6xbf16>
    %79 = vector.shape_cast %76 : vector<4x8x6xbf16> to vector<1x4x8x6xbf16>
    tpu.vector_store %arg6[%c0_80, %c0_81, %c0_82, %c0_83], %79 {strides = array<i32>} : memref<1x4x8x6xbf16, #tpu.memory_space<vmem>>, vector<1x4x8x6xbf16>,
    return
  }
  func.func @transform_0(%arg0: i32) -> (i32, i32, i32, i32, i32) {
    %c0_i32 = arith.constant 0 : i32
    %c0_i32_0 = arith.constant 0 : i32
    %c0_i32_1 = arith.constant 0 : i32
    %c0_i32_2 = arith.constant 0 : i32
    %c0_i32_3 = arith.constant 0 : i32
    return %arg0, %c0_i32, %c0_i32_0, %c0_i32_1, %c0_i32_2 : i32, i32, i32, i32, i32
  }
  func.func @transform_1(%arg0: i32) -> (i32, i32, i32) {
    %c0_i32 = arith.constant 0 : i32
    %c0_i32_0 = arith.constant 0 : i32
    %c0_i32_1 = arith.constant 0 : i32
    %c0_i32_2 = arith.constant 0 : i32
    return %c0_i32, %c0_i32_0, %c0_i32_1 : i32, i32, i32
  }
  func.func @transform_2(%arg0: i32) -> (i32, i32) {
    %c0_i32 = arith.constant 0 : i32
    %c0_i32_0 = arith.constant 0 : i32
    %c0_i32_1 = arith.constant 0 : i32
    return %c0_i32, %c0_i32_0 : i32, i32
  }
  func.func @transform_3(%arg0: i32) -> (i32, i32) {
    %c0_i32 = arith.constant 0 : i32
    %c0_i32_0 = arith.constant 0 : i32
    %c0_i32_1 = arith.constant 0 : i32
    return %c0_i32, %c0_i32_0 : i32, i32
  }
  func.func @transform_4(%arg0: i32) -> (i32, i32) {
    %c0_i32 = arith.constant 0 : i32
    %c0_i32_0 = arith.constant 0 : i32
    %c0_i32_1 = arith.constant 0 : i32
    return %c0_i32, %c0_i32_0 : i32, i32
  }
  func.func @transform_5(%arg0: i32) -> (i32, i32, i32, i32) {
    %c0_i32 = arith.constant 0 : i32
    %c0_i32_0 = arith.constant 0 : i32
    %c0_i32_1 = arith.constant 0 : i32
    %c0_i32_2 = arith.constant 0 : i32
    return %arg0, %c0_i32, %c0_i32_0, %c0_i32_1 : i32, i32, i32, i32
  }
}

module attributes {stable_mosaic.version = 11 : i64} {
  func.func @_conv_tap_kernel(%arg0: i32, %arg1: memref<1x4x5x9x16xbf16, #tpu.memory_space<vmem>>, %arg2: memref<9x16x32xbf16, #tpu.memory_space<vmem>>, %arg3: memref<1x32xf32, #tpu.memory_space<vmem>>, %arg4: memref<1x4x8x32xbf16, #tpu.memory_space<vmem>>) attributes {dimension_semantics = [#tpu.dimension_semantics<parallel>], iteration_bounds = array<i64: 2>, scalar_prefetch = 0 : i64, scratch_operands = 0 : i64, tpu.core_type = #tpu.core_type<tc>, window_params = [{transform_indices = @transform_0, window_bounds = array<i64: 1, 4, 5, 9, 16>}, {pipeline_mode = #tpu.pipeline_mode<synchronous>, transform_indices = @transform_1, window_bounds = array<i64: 9, 16, 32>}, {pipeline_mode = #tpu.pipeline_mode<synchronous>, transform_indices = @transform_2, window_bounds = array<i64: 1, 32>}, {transform_indices = @transform_3, window_bounds = array<i64: 1, 4, 8, 32>}]} {
    %cst = arith.constant 0.000000e+00 : f32
    %0 = vector.broadcast %cst : f32 to vector<32x32xf32>
    %c0 = arith.constant 0 : index
    %c0_0 = arith.constant 0 : index
    %c0_1 = arith.constant 0 : index
    %c0_2 = arith.constant 0 : index
    %c0_3 = arith.constant 0 : index
    %1 = vector.load %arg1[%c0, %c0_0, %c0_1, %c0_2, %c0_3] : memref<1x4x5x9x16xbf16, #tpu.memory_space<vmem>>, vector<1x1x4x8x16xbf16>
    %2 = vector.shape_cast %1 : vector<1x1x4x8x16xbf16> to vector<4x8x16xbf16>
    %3 = vector.shape_cast %2 : vector<4x8x16xbf16> to vector<32x16xbf16>
    %c0_4 = arith.constant 0 : index
    %c0_5 = arith.constant 0 : index
    %c0_6 = arith.constant 0 : index
    %4 = vector.load %arg2[%c0_4, %c0_5, %c0_6] : memref<9x16x32xbf16, #tpu.memory_space<vmem>>, vector<1x16x32xbf16>
    %5 = vector.shape_cast %4 : vector<1x16x32xbf16> to vector<16x32xbf16>
    %cst_7 = arith.constant dense<0.000000e+00> : vector<32x32xf32>
    %6 = tpu.matmul %3, %5, %cst_7 {dimension_numbers = #tpu.dot_dimension_numbers<[1], [0], [0], [1], [0, 0, 1, 1], [], []>} : vector<32x16xbf16>, vector<16x32xbf16>, vector<32x32xf32> -> vector<32x32xf32>
    %7 = arith.addf %0, %6 : vector<32x32xf32>
    %c0_8 = arith.constant 0 : index
    %c1 = arith.constant 1 : index
    %c0_9 = arith.constant 0 : index
    %c0_10 = arith.constant 0 : index
    %c0_11 = arith.constant 0 : index
    %8 = vector.load %arg1[%c0_8, %c1, %c0_9, %c0_10, %c0_11] : memref<1x4x5x9x16xbf16, #tpu.memory_space<vmem>>, vector<1x1x4x8x16xbf16>
    %9 = vector.shape_cast %8 : vector<1x1x4x8x16xbf16> to vector<4x8x16xbf16>
    %10 = vector.shape_cast %9 : vector<4x8x16xbf16> to vector<32x16xbf16>
    %c1_12 = arith.constant 1 : index
    %c0_13 = arith.constant 0 : index
    %c0_14 = arith.constant 0 : index
    %11 = vector.load %arg2[%c1_12, %c0_13, %c0_14] : memref<9x16x32xbf16, #tpu.memory_space<vmem>>, vector<1x16x32xbf16>
    %12 = vector.shape_cast %11 : vector<1x16x32xbf16> to vector<16x32xbf16>
    %cst_15 = arith.constant dense<0.000000e+00> : vector<32x32xf32>
    %13 = tpu.matmul %10, %12, %cst_15 {dimension_numbers = #tpu.dot_dimension_numbers<[1], [0], [0], [1], [0, 0, 1, 1], [], []>} : vector<32x16xbf16>, vector<16x32xbf16>, vector<32x32xf32> -> vector<32x32xf32>
    %14 = arith.addf %7, %13 : vector<32x32xf32>
    %c0_16 = arith.constant 0 : index
    %c0_17 = arith.constant 0 : index
    %c0_18 = arith.constant 0 : index
    %c1_19 = arith.constant 1 : index
    %c0_20 = arith.constant 0 : index
    %15 = vector.load %arg1[%c0_16, %c0_17, %c0_18, %c1_19, %c0_20] : memref<1x4x5x9x16xbf16, #tpu.memory_space<vmem>>, vector<1x1x4x8x16xbf16>
    %16 = vector.shape_cast %15 : vector<1x1x4x8x16xbf16> to vector<4x8x16xbf16>
    %17 = vector.shape_cast %16 : vector<4x8x16xbf16> to vector<32x16xbf16>
    %c2 = arith.constant 2 : index
    %c0_21 = arith.constant 0 : index
    %c0_22 = arith.constant 0 : index
    %18 = vector.load %arg2[%c2, %c0_21, %c0_22] : memref<9x16x32xbf16, #tpu.memory_space<vmem>>, vector<1x16x32xbf16>
    %19 = vector.shape_cast %18 : vector<1x16x32xbf16> to vector<16x32xbf16>
    %cst_23 = arith.constant dense<0.000000e+00> : vector<32x32xf32>
    %20 = tpu.matmul %17, %19, %cst_23 {dimension_numbers = #tpu.dot_dimension_numbers<[1], [0], [0], [1], [0, 0, 1, 1], [], []>} : vector<32x16xbf16>, vector<16x32xbf16>, vector<32x32xf32> -> vector<32x32xf32>
    %21 = arith.addf %14, %20 : vector<32x32xf32>
    %c0_24 = arith.constant 0 : index
    %c2_25 = arith.constant 2 : index
    %c0_26 = arith.constant 0 : index
    %c0_27 = arith.constant 0 : index
    %c0_28 = arith.constant 0 : index
    %22 = vector.load %arg1[%c0_24, %c2_25, %c0_26, %c0_27, %c0_28] : memref<1x4x5x9x16xbf16, #tpu.memory_space<vmem>>, vector<1x1x4x8x16xbf16>
    %23 = vector.shape_cast %22 : vector<1x1x4x8x16xbf16> to vector<4x8x16xbf16>
    %24 = vector.shape_cast %23 : vector<4x8x16xbf16> to vector<32x16xbf16>
    %c3 = arith.constant 3 : index
    %c0_29 = arith.constant 0 : index
    %c0_30 = arith.constant 0 : index
    %25 = vector.load %arg2[%c3, %c0_29, %c0_30] : memref<9x16x32xbf16, #tpu.memory_space<vmem>>, vector<1x16x32xbf16>
    %26 = vector.shape_cast %25 : vector<1x16x32xbf16> to vector<16x32xbf16>
    %cst_31 = arith.constant dense<0.000000e+00> : vector<32x32xf32>
    %27 = tpu.matmul %24, %26, %cst_31 {dimension_numbers = #tpu.dot_dimension_numbers<[1], [0], [0], [1], [0, 0, 1, 1], [], []>} : vector<32x16xbf16>, vector<16x32xbf16>, vector<32x32xf32> -> vector<32x32xf32>
    %28 = arith.addf %21, %27 : vector<32x32xf32>
    %c0_32 = arith.constant 0 : index
    %c3_33 = arith.constant 3 : index
    %c0_34 = arith.constant 0 : index
    %c0_35 = arith.constant 0 : index
    %c0_36 = arith.constant 0 : index
    %29 = vector.load %arg1[%c0_32, %c3_33, %c0_34, %c0_35, %c0_36] : memref<1x4x5x9x16xbf16, #tpu.memory_space<vmem>>, vector<1x1x4x8x16xbf16>
    %30 = vector.shape_cast %29 : vector<1x1x4x8x16xbf16> to vector<4x8x16xbf16>
    %31 = vector.shape_cast %30 : vector<4x8x16xbf16> to vector<32x16xbf16>
    %c4 = arith.constant 4 : index
    %c0_37 = arith.constant 0 : index
    %c0_38 = arith.constant 0 : index
    %32 = vector.load %arg2[%c4, %c0_37, %c0_38] : memref<9x16x32xbf16, #tpu.memory_space<vmem>>, vector<1x16x32xbf16>
    %33 = vector.shape_cast %32 : vector<1x16x32xbf16> to vector<16x32xbf16>
    %cst_39 = arith.constant dense<0.000000e+00> : vector<32x32xf32>
    %34 = tpu.matmul %31, %33, %cst_39 {dimension_numbers = #tpu.dot_dimension_numbers<[1], [0], [0], [1], [0, 0, 1, 1], [], []>} : vector<32x16xbf16>, vector<16x32xbf16>, vector<32x32xf32> -> vector<32x32xf32>
    %35 = arith.addf %28, %34 : vector<32x32xf32>
    %c0_40 = arith.constant 0 : index
    %c2_41 = arith.constant 2 : index
    %c0_42 = arith.constant 0 : index
    %c1_43 = arith.constant 1 : index
    %c0_44 = arith.constant 0 : index
    %36 = vector.load %arg1[%c0_40, %c2_41, %c0_42, %c1_43, %c0_44] : memref<1x4x5x9x16xbf16, #tpu.memory_space<vmem>>, vector<1x1x4x8x16xbf16>
    %37 = vector.shape_cast %36 : vector<1x1x4x8x16xbf16> to vector<4x8x16xbf16>
    %38 = vector.shape_cast %37 : vector<4x8x16xbf16> to vector<32x16xbf16>
    %c5 = arith.constant 5 : index
    %c0_45 = arith.constant 0 : index
    %c0_46 = arith.constant 0 : index
    %39 = vector.load %arg2[%c5, %c0_45, %c0_46] : memref<9x16x32xbf16, #tpu.memory_space<vmem>>, vector<1x16x32xbf16>
    %40 = vector.shape_cast %39 : vector<1x16x32xbf16> to vector<16x32xbf16>
    %cst_47 = arith.constant dense<0.000000e+00> : vector<32x32xf32>
    %41 = tpu.matmul %38, %40, %cst_47 {dimension_numbers = #tpu.dot_dimension_numbers<[1], [0], [0], [1], [0, 0, 1, 1], [], []>} : vector<32x16xbf16>, vector<16x32xbf16>, vector<32x32xf32> -> vector<32x32xf32>
    %42 = arith.addf %35, %41 : vector<32x32xf32>
    %c0_48 = arith.constant 0 : index
    %c0_49 = arith.constant 0 : index
    %c1_50 = arith.constant 1 : index
    %c0_51 = arith.constant 0 : index
    %c0_52 = arith.constant 0 : index
    %43 = vector.load %arg1[%c0_48, %c0_49, %c1_50, %c0_51, %c0_52] : memref<1x4x5x9x16xbf16, #tpu.memory_space<vmem>>, vector<1x1x4x8x16xbf16>
    %44 = vector.shape_cast %43 : vector<1x1x4x8x16xbf16> to vector<4x8x16xbf16>
    %45 = vector.shape_cast %44 : vector<4x8x16xbf16> to vector<32x16xbf16>
    %c6 = arith.constant 6 : index
    %c0_53 = arith.constant 0 : index
    %c0_54 = arith.constant 0 : index
    %46 = vector.load %arg2[%c6, %c0_53, %c0_54] : memref<9x16x32xbf16, #tpu.memory_space<vmem>>, vector<1x16x32xbf16>
    %47 = vector.shape_cast %46 : vector<1x16x32xbf16> to vector<16x32xbf16>
    %cst_55 = arith.constant dense<0.000000e+00> : vector<32x32xf32>
    %48 = tpu.matmul %45, %47, %cst_55 {dimension_numbers = #tpu.dot_dimension_numbers<[1], [0], [0], [1], [0, 0, 1, 1], [], []>} : vector<32x16xbf16>, vector<16x32xbf16>, vector<32x32xf32> -> vector<32x32xf32>
    %49 = arith.addf %42, %48 : vector<32x32xf32>
    %c0_56 = arith.constant 0 : index
    %c1_57 = arith.constant 1 : index
    %c1_58 = arith.constant 1 : index
    %c0_59 = arith.constant 0 : index
    %c0_60 = arith.constant 0 : index
    %50 = vector.load %arg1[%c0_56, %c1_57, %c1_58, %c0_59, %c0_60] : memref<1x4x5x9x16xbf16, #tpu.memory_space<vmem>>, vector<1x1x4x8x16xbf16>
    %51 = vector.shape_cast %50 : vector<1x1x4x8x16xbf16> to vector<4x8x16xbf16>
    %52 = vector.shape_cast %51 : vector<4x8x16xbf16> to vector<32x16xbf16>
    %c7 = arith.constant 7 : index
    %c0_61 = arith.constant 0 : index
    %c0_62 = arith.constant 0 : index
    %53 = vector.load %arg2[%c7, %c0_61, %c0_62] : memref<9x16x32xbf16, #tpu.memory_space<vmem>>, vector<1x16x32xbf16>
    %54 = vector.shape_cast %53 : vector<1x16x32xbf16> to vector<16x32xbf16>
    %cst_63 = arith.constant dense<0.000000e+00> : vector<32x32xf32>
    %55 = tpu.matmul %52, %54, %cst_63 {dimension_numbers = #tpu.dot_dimension_numbers<[1], [0], [0], [1], [0, 0, 1, 1], [], []>} : vector<32x16xbf16>, vector<16x32xbf16>, vector<32x32xf32> -> vector<32x32xf32>
    %56 = arith.addf %49, %55 : vector<32x32xf32>
    %c0_64 = arith.constant 0 : index
    %c0_65 = arith.constant 0 : index
    %c1_66 = arith.constant 1 : index
    %c1_67 = arith.constant 1 : index
    %c0_68 = arith.constant 0 : index
    %57 = vector.load %arg1[%c0_64, %c0_65, %c1_66, %c1_67, %c0_68] : memref<1x4x5x9x16xbf16, #tpu.memory_space<vmem>>, vector<1x1x4x8x16xbf16>
    %58 = vector.shape_cast %57 : vector<1x1x4x8x16xbf16> to vector<4x8x16xbf16>
    %59 = vector.shape_cast %58 : vector<4x8x16xbf16> to vector<32x16xbf16>
    %c8 = arith.constant 8 : index
    %c0_69 = arith.constant 0 : index
    %c0_70 = arith.constant 0 : index
    %60 = vector.load %arg2[%c8, %c0_69, %c0_70] : memref<9x16x32xbf16, #tpu.memory_space<vmem>>, vector<1x16x32xbf16>
    %61 = vector.shape_cast %60 : vector<1x16x32xbf16> to vector<16x32xbf16>
    %cst_71 = arith.constant dense<0.000000e+00> : vector<32x32xf32>
    %62 = tpu.matmul %59, %61, %cst_71 {dimension_numbers = #tpu.dot_dimension_numbers<[1], [0], [0], [1], [0, 0, 1, 1], [], []>} : vector<32x16xbf16>, vector<16x32xbf16>, vector<32x32xf32> -> vector<32x32xf32>
    %63 = arith.addf %56, %62 : vector<32x32xf32>
    %c0_72 = arith.constant 0 : index
    %c0_73 = arith.constant 0 : index
    %64 = vector.load %arg3[%c0_72, %c0_73] : memref<1x32xf32, #tpu.memory_space<vmem>>, vector<1x32xf32>
    %65 = vector.broadcast %64 : vector<1x32xf32> to vector<32x32xf32>
    %66 = arith.addf %63, %65 : vector<32x32xf32>
    %cst_74 = arith.constant 0.000000e+00 : f32
    %67 = vector.broadcast %cst_74 : f32 to vector<32x32xf32>
    %68 = arith.maximumf %66, %67 : vector<32x32xf32>
    %69 = vector.shape_cast %68 : vector<32x32xf32> to vector<4x8x32xf32>
    %70 = arith.truncf %69 : vector<4x8x32xf32> to vector<4x8x32xbf16>
    %c0_75 = arith.constant 0 : index
    %c0_76 = arith.constant 0 : index
    %c0_77 = arith.constant 0 : index
    %c0_78 = arith.constant 0 : index
    %71 = vector.load %arg4[%c0_75, %c0_76, %c0_77, %c0_78] : memref<1x4x8x32xbf16, #tpu.memory_space<vmem>>, vector<1x4x8x32xbf16>
    %72 = vector.shape_cast %71 : vector<1x4x8x32xbf16> to vector<4x8x32xbf16>
    %73 = vector.shape_cast %70 : vector<4x8x32xbf16> to vector<1x4x8x32xbf16>
    tpu.vector_store %arg4[%c0_75, %c0_76, %c0_77, %c0_78], %73 {strides = array<i32>} : memref<1x4x8x32xbf16, #tpu.memory_space<vmem>>, vector<1x4x8x32xbf16>,
    return
  }
  func.func @transform_0(%arg0: i32) -> (i32, i32, i32, i32, i32) {
    %c0_i32 = arith.constant 0 : i32
    %c0_i32_0 = arith.constant 0 : i32
    %c0_i32_1 = arith.constant 0 : i32
    %c0_i32_2 = arith.constant 0 : i32
    %c0_i32_3 = arith.constant 0 : i32
    return %arg0, %c0_i32, %c0_i32_0, %c0_i32_1, %c0_i32_2 : i32, i32, i32, i32, i32
  }
  func.func @transform_1(%arg0: i32) -> (i32, i32, i32) {
    %c0_i32 = arith.constant 0 : i32
    %c0_i32_0 = arith.constant 0 : i32
    %c0_i32_1 = arith.constant 0 : i32
    %c0_i32_2 = arith.constant 0 : i32
    return %c0_i32, %c0_i32_0, %c0_i32_1 : i32, i32, i32
  }
  func.func @transform_2(%arg0: i32) -> (i32, i32) {
    %c0_i32 = arith.constant 0 : i32
    %c0_i32_0 = arith.constant 0 : i32
    %c0_i32_1 = arith.constant 0 : i32
    return %c0_i32, %c0_i32_0 : i32, i32
  }
  func.func @transform_3(%arg0: i32) -> (i32, i32, i32, i32) {
    %c0_i32 = arith.constant 0 : i32
    %c0_i32_0 = arith.constant 0 : i32
    %c0_i32_1 = arith.constant 0 : i32
    %c0_i32_2 = arith.constant 0 : i32
    return %arg0, %c0_i32, %c0_i32_0, %c0_i32_1 : i32, i32, i32, i32
  }
}

module attributes {stable_mosaic.version = 11 : i64} {
  func.func @_bilinear_kernel(%arg0: i32, %arg1: i32, %arg2: memref<8x4xf32, #tpu.memory_space<vmem>>, %arg3: memref<4x48xbf16, #tpu.memory_space<vmem>>, %arg4: memref<48x192xf32, #tpu.memory_space<vmem>>, %arg5: memref<8x192xf32, #tpu.memory_space<vmem>>) attributes {dimension_semantics = [#tpu.dimension_semantics<parallel>, #tpu.dimension_semantics<parallel>], iteration_bounds = array<i64: 2, 1>, scalar_prefetch = 0 : i64, scratch_operands = 0 : i64, tpu.core_type = #tpu.core_type<tc>, window_params = [{transform_indices = @transform_0, window_bounds = array<i64: 8, 4>}, {transform_indices = @transform_1, window_bounds = array<i64: 4, 48>}, {pipeline_mode = #tpu.pipeline_mode<synchronous>, transform_indices = @transform_2, window_bounds = array<i64: 48, 192>}, {transform_indices = @transform_3, window_bounds = array<i64: 8, 192>}]} {
    %c0 = arith.constant 0 : index
    %c0_0 = arith.constant 0 : index
    %0 = vector.load %arg2[%c0, %c0_0] : memref<8x4xf32, #tpu.memory_space<vmem>>, vector<8x4xf32>
    %c0_1 = arith.constant 0 : index
    %c0_2 = arith.constant 0 : index
    %1 = vector.load %arg3[%c0_1, %c0_2] : memref<4x48xbf16, #tpu.memory_space<vmem>>, vector<4x48xbf16>
    %2 = arith.extf %1 : vector<4x48xbf16> to vector<4x48xf32>
    %cst = arith.constant dense<0.000000e+00> : vector<8x48xf32>
    %3 = tpu.matmul %0, %2, %cst {dimension_numbers = #tpu.dot_dimension_numbers<[1], [0], [0], [1], [0, 0, 1, 1], [], []>} : vector<8x4xf32>, vector<4x48xf32>, vector<8x48xf32> -> vector<8x48xf32>
    %c0_3 = arith.constant 0 : index
    %c0_4 = arith.constant 0 : index
    %4 = vector.load %arg4[%c0_3, %c0_4] : memref<48x192xf32, #tpu.memory_space<vmem>>, vector<48x192xf32>
    %cst_5 = arith.constant dense<0.000000e+00> : vector<8x192xf32>
    %5 = tpu.matmul %3, %4, %cst_5 {dimension_numbers = #tpu.dot_dimension_numbers<[1], [0], [0], [1], [0, 0, 1, 1], [], []>} : vector<8x48xf32>, vector<48x192xf32>, vector<8x192xf32> -> vector<8x192xf32>
    %c0_6 = arith.constant 0 : index
    %c0_7 = arith.constant 0 : index
    %6 = vector.load %arg5[%c0_6, %c0_7] : memref<8x192xf32, #tpu.memory_space<vmem>>, vector<8x192xf32>
    tpu.vector_store %arg5[%c0_6, %c0_7], %5 {strides = array<i32>} : memref<8x192xf32, #tpu.memory_space<vmem>>, vector<8x192xf32>,
    return
  }
  func.func @transform_0(%arg0: i32, %arg1: i32) -> (i32, i32) {
    %c0_i32 = arith.constant 0 : i32
    %c0_i32_0 = arith.constant 0 : i32
    return %arg0, %c0_i32 : i32, i32
  }
  func.func @transform_1(%arg0: i32, %arg1: i32) -> (i32, i32) {
    %c0_i32 = arith.constant 0 : i32
    %c0_i32_0 = arith.constant 0 : i32
    return %c0_i32, %arg1 : i32, i32
  }
  func.func @transform_2(%arg0: i32, %arg1: i32) -> (i32, i32) {
    %c0_i32 = arith.constant 0 : i32
    %c0_i32_0 = arith.constant 0 : i32
    %c0_i32_1 = arith.constant 0 : i32
    return %c0_i32, %c0_i32_0 : i32, i32
  }
  func.func @transform_3(%arg0: i32, %arg1: i32) -> (i32, i32) {
    %c0_i32 = arith.constant 0 : i32
    return %arg0, %arg1 : i32, i32
  }
}

</mosaic_0001>

<bundles_post_ra>
// kernel: multi_task_forward.6
= control target key start
LH: loop header
LB: loop body
LE: loop exit
PB: predicated region body
PF: predicated region fallthrough
CT: control target
= control target key end

     0   :  { %s1818_s18 = smov 0   ;;  %s2095_s0 = inlined_call_operand.vmem [shape: bf16[2,1,6,10,32], index: 0, kind: input, shape index: {}]   ;;  %s2096_s1 = inlined_call_operand.vmem [shape: bf16[9,32,64], index: 1, kind: input, shape index: {}]   ;;  %s2097_s2 = inlined_call_operand.vmem [shape: f32[1,64], index: 2, kind: input, shape index: {}]   ;;  %s2098_s3 = inlined_call_operand.vmem [shape: bf16[64,6], index: 3, kind: input, shape index: {}]   ;;  %s2099_s4 = inlined_call_operand.vmem [shape: f32[1,6], index: 4, kind: input, shape index: {}]   ;;  %s2100_s5 = inlined_call_operand.vmem [shape: bf16[2,4,8,6], index: 5, kind: output, shape index: {}]  }
   0x1 LB: > { %s1436_s19 = sadd.s32 4294967295, %s1786_s18   ;;  %p1440_p0 = scmp.ge.s32.totalorder %s1786_s18, 1  ;;  %s1786_s18 = sphi %s1818_s18, %s15_s18  }
   0x2   : > { %p187_p1 = scmp.lt.s32.totalorder %s1786_s18, 3 }
   0x4   : > { %p188_p2 = pnand %p1440_p0, %p187_p1 }
   0x5   : > { %v1752_v0 = vld [vmem:[%s2096_s1 + $0x30] sm:$0xff] (!%p188_p2)   ;;  %p215_p3 = scmp.lt.s32.totalorder (!%p188_p2), %s1436_s19, 1  ;;  %v1753_v1 = vld [vmem:[%s2096_s1 + $0x38] sm:$0xff] (!%p188_p2)   ;;  %v1756_v2 = vld [vmem:[%s2096_s1 + $0x40] sm:$0xff] (!%p188_p2)   ;;  %vm320_vm0 = vcmask (!%p188_p2), 261120   ;;  %vm465_vm4 = vcmask (!%p188_p2), 1042432  }
   0x6   : > { %191 = sbr.rel (%p188_p2) target bundleno = 537 (0x219), region = 40  ;;  %1651 = vmatprep.subr.bf16.mxu0 (!%p188_p2), %v1752_v0  ;;  %v1757_v3 = vld [vmem:[%s2096_s1 + $0x10] sm:$0xff] (!%p188_p2)   ;;  %v1758_v4 = vld [vmem:[%s2096_s1 + $0x18] sm:$0xff] (!%p188_p2)   ;;  %v1759_v5 = vld [vmem:[%s2096_s1 + $0x48] sm:$0xff] (!%p188_p2)   ;;  %vm238_vm1 = vsmask.f32 (!%p188_p2), 3328 }
   0x7   : > { %1652 = vmatpush3.bf16.msra.mxu0 (!%p188_p2), %v1752_v0  ;;  %1627 = vmatprep.subr.bf16.mxu1 (!%p188_p2), %v1757_v3  ;;  %vm239_vm2 = vsmask.f32 (!%p188_p2), 7440  ;;  %v1892_v32 = vld [vmem:[%s2096_s1 + $0x50] sm:$0xff] (!%p188_p2)   ;;  %v1761_v39 = vld [vmem:[%s2096_s1] sm:$0xff] (!%p188_p2)   ;;  %vm466_vm5 = vcmask (!%p188_p2), 1046532   ;;  %vm1316_vm7 = vcmask (!%p188_p2), 523264  }
   0x8   : > { %1653 = vmatprep.subr.bf16.mxu0 (!%p188_p2), %v1753_v1  ;;  %1628 = vmatpush3.bf16.msra.mxu1 (!%p188_p2), %v1757_v3  ;;  %vm1896_vm3 = vmor (!%p188_p2), %vm238_vm1, %vm239_vm2  ;;  %vm1376_vm8 = vcmask (!%p188_p2), 44032  }
   0x9   : > { %1629 = vmatprep.subr.bf16.mxu1 (!%p188_p2), %v1758_v4  ;;  %vm1957_vm6 = vmor (!%p188_p2), %vm465_vm4, %vm466_vm5 }
   0xb   : > { %1654 = vmatpush3.bf16.msra.mxu0 (!%p188_p2), %v1753_v1 }
   0xc   : > { %1659 = vmatprep.subr.bf16.mxu0 (!%p188_p2), %v1756_v2  ;;  %1630 = vmatpush3.bf16.msra.mxu1 (!%p188_p2), %v1758_v4 }
   0xd   : > { %s2106_s19 = smov (!%p215_p3, %s1436_s19), 1  ;;  %1635 = vmatprep.subr.bf16.mxu1 %v1761_v39 }
   0xe   : > { %s1743_s28 = smul.u32 48, %s2106_s19  ;;  %s1584_s26 = sshll.u32 %s2106_s19, 4 }
   0xf   : > { %s224_s29 = scalar_lea.vmem %s2100_s5, %s1584_s26 }
  0x10   : > { %s1847_s8 = scalar_lea.vmem %s2095_s0, %s1743_s28 }
  0x11   : > { %v1754_v6 = vld [vmem:[%s1847_s8 + $0x8] ss:$8 sps:$4 sm:$0xff]   ;;  %v1755_v7 = vld [vmem:[%s1847_s8 + $0x18] ss:$8 sps:$4 sm:$0xff]   ;;  %v1862_v10 = vld [vmem:[%s1847_s8 + $0x4] sm:$0x1] }
  0x12   : > { %1655 = vmatprep.mubr.msk.bf16.mxu0 %vm320_vm0, %v1754_v6  ;;  %v1856_v8 = vld [vmem:[%s1847_s8] sm:$0xf]  ;;  %v1859_v9 = vld [vmem:[%s1847_s8 + $0x8] sm:$0xf]  ;;  %v1866_v11 = vld [vmem:[%s1847_s8 + $0xc] sm:$0x1] }
  0x13   : > { %1656 = vmatmul.mubr.msk.bf16.vlgmr.msra.gmra.mrb[0].mxu0 %vm320_vm0, %v1755_v7  ;;  %v242_v12 = vshrl.u32 %v1856_v8, 16  ;;  %v245_v13 = vshll.u32 %v1856_v8, 16  ;;  %v251_v14 = vshll.u32 %v1862_v10, 16  ;;  %v256_v15 = vshrl.u32 %v1859_v9, 16  ;;  %v1875_v18 = vld [vmem:[%s1847_s8 + $0x10] sm:$0xf] }
  0x14   : > { %1660 = vmatpush3.bf16.msra.mxu0 %v1756_v2  ;;  %v259_v16 = vshll.u32 %v1859_v9, 16  ;;  %v265_v17 = vshll.u32 %v1866_v11, 16  ;;  %v1878_v23 = vld [vmem:[%s1847_s8 + $0x18] sm:$0xf]  ;;  %v1881_v26 = vld [vmem:[%s1847_s8 + $0x14] sm:$0x1]  ;;  %v1454_v48 = vcombine.low %v1856_v8, %v1859_v9 }
  0x15   : > { %1661 = vmatprep.subr.bf16.mxu0 %v1759_v5  ;;  %v244_v19 = vrot.slane %v242_v12, 4  ;;  %v247_v20 = vrot.slane %v245_v13, 5  ;;  %v253_v21 = vrot.slane %v251_v14, 5  ;;  %v258_v22 = vrot.slane %v256_v15, 4  ;;  %v1884_v27 = vld [vmem:[%s1847_s8 + $0x1c] sm:$0x1] }
  0x16   : > { %v261_v24 = vrot.slane %v259_v16, 5  ;;  %v267_v25 = vrot.slane %v265_v17, 5  ;;  %v270_v29 = vshrl.u32 %v1875_v18, 16  ;;  %v273_v30 = vshll.u32 %v1875_v18, 16  ;;  %v1488_v38 = vld [vmem:[%s1847_s8 + $0x8] sm:$0xf] }
  0x17   : > { %v248_v28 = vor.u32 %v247_v20, %v244_v19  ;;  %v279_v31 = vshll.u32 %v1881_v26, 16  ;;  %v284_v35 = vshrl.u32 %v1878_v23, 16  ;;  %v287_v36 = vshll.u32 %v1878_v23, 16  ;;  %v1908_v43 = vld [vmem:[%s1847_s8 + $0xc] sm:$0x1] }
  0x18   : > { %1662 = vmatpush3.bf16.msra.mxu0 %v1759_v5  ;;  %v262_v34 = vor.u32 %v261_v24, %v258_v22  ;;  %v293_v37 = vshll.u32 %v1884_v27, 16  ;;  %v272_v41 = vrot.slane %v270_v29, 4  ;;  %v275_v42 = vrot.slane %v273_v30, 5  ;;  %v1490_v47 = vld [vmem:[%s1847_s8 + $0x10] sm:$0xf] }
  0x19   : > { %v249_v40 = vrot.slane %v248_v28, 4  ;;  %1667 = vmatprep.subr.bf16.mxu0 %v1892_v32  ;;  %v286_v45 = vrot.slane %v284_v35, 4  ;;  %v289_v46 = vrot.slane %v287_v36, 5  ;;  %v281_v51 = vrot.slane %v279_v31, 5  ;;  %v1917_v53 = vld [vmem:[%s1847_s8 + $0x14] sm:$0x1] }
  0x1a   : > { %v263_v44 = vrot.slane %v262_v34, 4  ;;  %v276_v50 = vor.u32 %v275_v42, %v272_v41  ;;  %v295_v52 = vrot.slane %v293_v37, 5  ;;  %v666_v56 = vshrl.u32 %v1488_v38, 16  ;;  %v1492_v58 = vld [vmem:[%s1847_s8 + $0x18] sm:$0xf] }
  0x1b   : > { %v254_v49 = vsel %vm1896_vm3, %v249_v40, %v253_v21  ;;  %v290_v55 = vor.u32 %v289_v46, %v286_v45  ;;  %v669_v57 = vshll.u32 %v1488_v38, 16  ;;  %v1923_v59 = vld [vmem:[%s1847_s8 + $0x1c] sm:$0x1]  ;;  %v675_v62 = vshll.u32 %v1908_v43, 16  ;;  %v1494_v0 = vld [vmem:[%s1847_s8 + $0x20] sm:$0xf] }
  0x1c   : > { %v268_v54 = vsel %vm1896_vm3, %v263_v44, %v267_v25  ;;  %v277_v61 = vrot.slane %v276_v50, 4  ;;  %v680_v63 = vshrl.u32 %v1490_v47, 16  ;;  %v668_v2 = vrot.slane %v666_v56, 4  ;;  %v1928_v5 = vld [vmem:[%s1847_s8 + $0x24] sm:$0x1]  ;;  %v1762_v21 = vld [vmem:[%s2096_s1 + $0x8] sm:$0xff]  }
  0x1d   : > { %v1448_v60 = vcombine.low %v254_v49, %v268_v54  ;;  %v291_v1 = vrot.slane %v290_v55, 4  ;;  %v671_v3 = vrot.slane %v669_v57, 5  ;;  %v683_v4 = vshll.u32 %v1490_v47, 16  ;;  %v1506_v35 = vld [vmem:[%s1847_s8 + $0x8] sm:$0xe]  ;;  %v1767_v46 = vld [vmem:[%s2096_s1 + $0x20] sm:$0xff]  }
  0x1e   : > { %v282_v6 = vsel %vm1896_vm3, %v277_v61, %v281_v51  ;;  %v677_v7 = vrot.slane %v675_v62, 5  ;;  %v682_v8 = vrot.slane %v680_v63, 4  ;;  %v689_v9 = vshll.u32 %v1917_v53, 16  ;;  %v1507_v41 = vld [vmem:[%s1847_s8 + $0x10] sm:$0xe] }
  0x1f   : > { %1631 = vmatprep.mubr.msk.bf16.mxu1 %vm320_vm0, %v1448_v60  ;;  %v296_v12 = vsel %vm1896_vm3, %v291_v1, %v295_v52  ;;  %v672_v13 = vor.u32 %v671_v3, %v668_v2  ;;  %v685_v14 = vrot.slane %v683_v4, 5  ;;  %v694_v15 = vshrl.u32 %v1492_v58, 16  ;;  %v1508_v56 = vld [vmem:[%s1847_s8 + $0x18] sm:$0xe]  ;;  %v1509_v62 = vld [vmem:[%s1847_s8 + $0x20] sm:$0xe] }
  0x20   : > { %v1449_v16 = vcombine.low %v282_v6, %v296_v12  ;;  %v691_v17 = vrot.slane %v689_v9, 5  ;;  %v697_v19 = vshll.u32 %v1492_v58, 16  ;;  %v703_v20 = vshll.u32 %v1923_v59, 16  ;;  %v453_v63 = vld [vmem:[%s1847_s8] sm:$0xe]  ;;  %v1768_v3 = vld [vmem:[%s2096_s1 + $0x28] sm:$0xff]  }
  0x21   : > { %v673_v22 = vrot.slane %v672_v13, 4  ;;  %v686_v24 = vor.u32 %v685_v14, %v682_v8  ;;  %v696_v25 = vrot.slane %v694_v15, 4  ;;  %v708_v28 = vshrl.u32 %v1494_v0, 16  ;;  %v456_v8 = vld [vmem:[%s1847_s8 + $0x18] sm:$0xe]  ;;  %v1766_v13 = vld [vmem:[%s2096_s1 + $0x60] sm:$0xff]  }
  0x22   : > { %v470_v29 = vrot.slane %v1862_v10, 5  ;;  %1632 = vmatmul.mubr.msk.bf16.vlgmr.msra.gmra.mrb[0].mxu1 %vm320_vm0, %v1449_v16  ;;  %v699_v30 = vrot.slane %v697_v19, 5  ;;  %v711_v31 = vshll.u32 %v1494_v0, 16  ;;  %v717_v34 = vshll.u32 %v1928_v5, 16  ;;  %v454_v0 = vld [vmem:[%s1847_s8 + $0x8] sm:$0xe] }
  0x23   : > { %v678_v36 = vsel %vm1896_vm3, %v673_v22, %v677_v7  ;;  %v687_v37 = vrot.slane %v686_v24, 4  ;;  %v705_v38 = vrot.slane %v703_v20, 5  ;;  %v710_v40 = vrot.slane %v708_v28, 4  ;;  %1636 = vmatpush3.bf16.msra.mxu1 %v1761_v39  ;;  %1639 = vmatprep.mubr.msk.bf16.mxu1 %vm320_vm0, %v1454_v48  ;;  %v455_v7 = vld [vmem:[%s1847_s8 + $0x10] sm:$0xe] }
  0x24   : > { %v700_v42 = vor.u32 %v699_v30, %v696_v25  ;;  %v713_v44 = vrot.slane %v711_v31, 5  ;;  %1637 = vmatprep.subr.bf16.mxu1 %v1762_v21  ;;  %v1510_v10 = vrot.slane %v1506_v35, 9  ;;  %v817_v45 = vrot.slane %v1908_v43, 5  ;;  %v1540_v19 = vld [vmem:[%s1847_s8 + $0x18] sm:$0xf]  ;;  %v1778_v39 = vld [vmem:[%s2098_s3 + $0x10] sm:$0xff]  }
  0x25   : > { %v474_v47 = vrot.slane %v1866_v11, 5  ;;  %v692_v49 = vsel %vm1896_vm3, %v687_v37, %v691_v17  ;;  %v1511_v48 = vrot.slane %v1507_v41, 9  ;;  %v821_v50 = vrot.slane %v1917_v53, 5  ;;  %v2010_v28 = vld [vmem:[%s1847_s8 + $0x14] sm:$0x1] }
  0x26   : > { %v1500_v51 = vcombine.low %v678_v36, %v692_v49  ;;  %v701_v43 = vrot.slane %v700_v42, 4  ;;  %v714_v52 = vor.u32 %v713_v44, %v710_v40  ;;  %v719_v54 = vrot.slane %v717_v34, 5  ;;  %v1769_v42 = vld [vmem:[%s2096_s1 + $0x68] sm:$0xff]  }
  0x27   : > { %v478_v11 = vrot.slane %v1881_v26, 5  ;;  %v482_v55 = vrot.slane %v1884_v27, 5  ;;  %1638 = vmatpush3.bf16.msra.mxu1 %v1762_v21  ;;  %v818_v58 = vsel %vm1957_vm6, %v1510_v10, %v817_v45  ;;  %v822_v60 = vsel %vm1957_vm6, %v1511_v48, %v821_v50  ;;  %v1763_v26 = vld [vmem:[%s2096_s1 + $0x58] sm:$0xff]   ;;  %v1544_v49 = vld [vmem:[%s1847_s8 + $0x28] sm:$0xf]  ;;  %v1772_v48 = vld [vmem:[%s2096_s1 + $0x70] sm:$0xff]  }
  0x28   : > { %1663 = vmatprep.mubr.msk.bf16.mxu0 %vm320_vm0, %v1500_v51  ;;  %v706_v57 = vsel %vm1896_vm3, %v701_v43, %v705_v38  ;;  %v715_v53 = vrot.slane %v714_v52, 4  ;;  %1643 = vmatprep.subr.bf16.mxu1 %v1767_v46  ;;  %v1455_v61 = vcombine.low %v1875_v18, %v1878_v23  ;;  %v1518_v2 = vcombine.low %v818_v58, %v822_v60  ;;  %v1770_v10 = vld [vmem:[%s1847_s8 + $0x10] ss:$8 sps:$4 sm:$0xff]  }
  0x29   : > { %v1460_v4 = vrot.slane %v453_v63, 9  ;;  %v1461_v6 = vrot.slane %v454_v0, 9  ;;  %v1512_v9 = vrot.slane %v1508_v56, 9  ;;  %v825_v12 = vrot.slane %v1923_v59, 5  ;;  %v1771_v63 = vld [vmem:[%s1847_s8 + $0x20] ss:$8 sps:$4 sm:$0xff]  }
  0x2a   : > { %v720_v27 = vsel %vm1896_vm3, %v715_v53, %v719_v54  ;;  %v1513_v18 = vrot.slane %v1509_v62, 9  ;;  %v829_v23 = vrot.slane %v1928_v5, 5  ;;  %v1462_v16 = vrot.slane %v455_v7, 9  ;;  %v1538_v5 = vld [vmem:[%s1847_s8 + $0x10] sm:$0xf] }
  0x2b   : > { %v1501_v1 = vcombine.low %v706_v57, %v720_v27  ;;  %v471_v14 = vsel %vm1957_vm6, %v1460_v4, %v470_v29  ;;  %v475_v15 = vsel %vm1957_vm6, %v1461_v6, %v474_v47  ;;  %v1463_v17 = vrot.slane %v456_v8, 9  ;;  %v2013_v29 = vld [vmem:[%s1847_s8 + $0x1c] sm:$0x1]  ;;  %v1542_v47 = vld [vmem:[%s1847_s8 + $0x20] sm:$0xf] }
  0x2c   : > { %v1468_v59 = vcombine.low %v471_v14, %v475_v15  ;;  %v1013_v20 = vshrl.u32 %v1538_v5, 16  ;;  %v1016_v21 = vshll.u32 %v1538_v5, 16  ;;  %v1027_v22 = vshrl.u32 %v1540_v19, 16  ;;  %v1543_v57 = vld [vmem:[%s1847_s8 + $0x24] sm:$0x1]  ;;  %v1773_v6 = vld [vmem:[%s2096_s1 + $0x78] sm:$0xff]  }
  0x2d   : > { %1664 = vmatmul.mubr.msk.bf16.vlgmr.msra.gmra.mrb[0].mxu0 %vm320_vm0, %v1501_v1  ;;  %v830_v24 = vsel %vm1957_vm6, %v1513_v18, %v829_v23  ;;  %v479_v25 = vsel %vm1957_vm6, %v1462_v16, %v478_v11  ;;  %v1030_v30 = vshll.u32 %v1540_v19, 16  ;;  %v483_v31 = vsel %vm1957_vm6, %v1463_v17, %v482_v55  ;;  %v1545_v62 = vld [vmem:[%s1847_s8 + $0x2c] sm:$0x1]  ;;  %v1556_v7 = vld [vmem:[%s1847_s8 + $0x10] sm:$0xe] }
  0x2e   : > { %1668 = vmatpush3.bf16.msra.mxu0 %v1892_v32  ;;  %1640 = vmatmul.mubr.msk.bf16.vlgmr.msra.gmra.mrb[0].mxu1 %vm320_vm0, %v1455_v61  ;;  %v826_v32 = vsel %vm1957_vm6, %v1512_v9, %v825_v12  ;;  %v1015_v34 = vrot.slane %v1013_v20, 4  ;;  %v1018_v35 = vrot.slane %v1016_v21, 5  ;;  %v1029_v36 = vrot.slane %v1027_v22, 4  ;;  %v1557_v8 = vld [vmem:[%s1847_s8 + $0x18] sm:$0xe] }
  0x2f   : > { %1669 = vmatprep.subr.bf16.mxu0 %v1763_v26  ;;  %1671 = vmatprep.mubr.msk.bf16.mxu0 %vm320_vm0, %v1518_v2  ;;  %v1032_v37 = vrot.slane %v1030_v30, 5  ;;  %v1519_v38 = vcombine.low %v826_v32, %v830_v24  ;;  %v1022_v40 = vshll.u32 %v2010_v28, 16  ;;  %v1036_v41 = vshll.u32 %v2013_v29, 16  ;;  %v1775_v32 = vld [vmem:[%s2096_s1 + $0x88] sm:$0xff]   ;;  %v1558_v24 = vld [vmem:[%s1847_s8 + $0x20] sm:$0xe] }
  0x30   : > { %1644 = vmatpush3.bf16.msra.mxu1 %v1767_v46  ;;  %1647 = vmatprep.mubr.msk.bf16.mxu1 %vm320_vm0, %v1468_v59  ;;  %v1469_v44 = vcombine.low %v479_v25, %v483_v31  ;;  %v1019_v45 = vor.u32 %v1018_v35, %v1015_v34  ;;  %v1041_v43 = vshrl.u32 %v1542_v47, 16  ;;  %v1044_v52 = vshll.u32 %v1542_v47, 16  ;;  %v1559_v25 = vld [vmem:[%s1847_s8 + $0x28] sm:$0xe] }
  0x31   : > { %1645 = vmatprep.subr.bf16.mxu1 %v1768_v3  ;;  %v1033_v46 = vor.u32 %v1032_v37, %v1029_v36  ;;  %v1024_v50 = vrot.slane %v1022_v40, 5  ;;  %v1038_v51 = vrot.slane %v1036_v41, 5  ;;  %v1055_v54 = vshrl.u32 %v1544_v49, 16  ;;  %v1776_v36 = vld [vmem:[%s2098_s3] sm:$0xff]   ;;  %v1777_v37 = vld [vmem:[%s2098_s3 + $0x8] sm:$0xff]  }
  0x32   : > { %1670 = vmatpush3.bf16.msra.mxu0 %v1763_v26  ;;  %v1058_v11 = vshll.u32 %v1544_v49, 16  ;;  %v1020_v55 = vrot.slane %v1019_v45, 4  ;;  %v1043_v53 = vrot.slane %v1041_v43, 4  ;;  %v1046_v58 = vrot.slane %v1044_v52, 5  ;;  %v1574_v45 = vld [vmem:[%s2097_s2] ss:$0 sm:$0xff] }
  0x33   : > { %1675 = vmatprep.subr.bf16.mxu0 %v1766_v13  ;;  %v1034_v56 = vrot.slane %v1033_v46, 4  ;;  %v1057_v60 = vrot.slane %v1055_v54, 4  ;;  %v1050_v0 = vshll.u32 %v1543_v57, 16  ;;  %v1064_v4 = vshll.u32 %v1545_v62, 16 }
  0x34   : > { %1646 = vmatpush3.bf16.msra.mxu1 %v1768_v3  ;;  %v1060_v26 = vrot.slane %v1058_v11, 5  ;;  %v1025_v27 = vsel %vm1896_vm3, %v1020_v55, %v1024_v50  ;;  %v1047_v2 = vor.u32 %v1046_v58, %v1043_v53  ;;  %v1560_v14 = vrot.slane %v1556_v7, 9 }
  0x35   : > { %v1039_v61 = vsel %vm1896_vm3, %v1034_v56, %v1038_v51  ;;  %v1052_v12 = vrot.slane %v1050_v0, 5  ;;  %v1066_v23 = vrot.slane %v1064_v4, 5  ;;  %v1164_v15 = vrot.slane %v2010_v28, 5  ;;  %1699 = vmatprep.subr.bf16.mxu1 %v1776_v36 }
  0x36   : > { %v1550_v1 = vcombine.low %v1025_v27, %v1039_v61  ;;  %v1061_v3 = vor.u32 %v1060_v26, %v1057_v60  ;;  %v1048_v9 = vrot.slane %v1047_v2, 4  ;;  %v1561_v59 = vrot.slane %v1557_v8, 9  ;;  %v1575_v27 = vld [vmem:[%s2099_s4] ss:$0 sm:$0xff] }
  0x37   : > { %v1168_v16 = vrot.slane %v2013_v29, 5  ;;  %v1165_v19 = vsel %vm1957_vm6, %v1560_v14, %v1164_v15  ;;  %v1562_v33 = vrot.slane %v1558_v24, 9  ;;  %v1172_v28 = vrot.slane %v1543_v57, 5 }
  0x38   : > { %v1062_v18 = vrot.slane %v1061_v3, 4  ;;  %v1053_v17 = vsel %vm1896_vm3, %v1048_v9, %v1052_v12  ;;  %v1563_v29 = vrot.slane %v1559_v25, 9  ;;  %v1176_v30 = vrot.slane %v1545_v62, 5 }
  0x39   : > { %1672 = vmatmul.mubr.msk.bf16.vlgmr.msra.gmra.mrb[0].mxu0 %vm320_vm0, %v1519_v38  ;;  %v1169_v20 = vsel %vm1957_vm6, %v1561_v59, %v1168_v16  ;;  %v1173_v31 = vsel %vm1957_vm6, %v1562_v33, %v1172_v28  ;;  %v1779_v38 = vld [vmem:[%s2098_s3 + $0x18] sm:$0xff]  }
  0x3a   : > { %1676 = vmatpush3.bf16.msra.mxu0 %v1766_v13  ;;  %1648 = vmatmul.mubr.msk.bf16.vlgmr.msra.gmra.mrb[0].mxu1 %vm320_vm0, %v1469_v44  ;;  %v1774_v13 = vld [vmem:[%s2096_s1 + $0x80] sm:$0xff]   ;;  %v1067_v5 = vsel %vm1896_vm3, %v1062_v18, %v1066_v23  ;;  %v1568_v22 = vcombine.low %v1165_v19, %v1169_v20  ;;  %v1177_v34 = vsel %vm1957_vm6, %v1563_v29, %v1176_v30 }
  0x3b   : > { %1677 = vmatprep.subr.bf16.mxu0 %v1769_v42  ;;  %1679 = vmatprep.mubr.msk.bf16.mxu0 %vm320_vm0, %v1770_v10  ;;  %v1551_v21 = vcombine.low %v1053_v17, %v1067_v5  ;;  %v1569_v35 = vcombine.low %v1173_v31, %v1177_v34 }
  0x3c   : > { %1700 = vmatpush3.bf16.msra.mxu1 %v1776_v36 }
  0x3d   : > { %1701 = vmatprep.subr.bf16.mxu1 %v1777_v37 }
  0x3e   : > { %1678 = vmatpush3.bf16.msra.mxu0 %v1769_v42 }
  0x3f   : > { %1683 = vmatprep.subr.bf16.mxu0 %v1772_v48 }
  0x40   : > { %1702 = vmatpush3.bf16.msra.mxu1 %v1777_v37 }
  0x41   : > { %1703 = vmatprep.subr.bf16.mxu1 %v1778_v39 }
  0x44   : > { %1704 = vmatpush3.bf16.msra.mxu1 %v1778_v39 }
  0x45   : > { %1680 = vmatmul.mubr.msk.bf16.vlgmr.msra.gmra.mrb[0].mxu0 %vm320_vm0, %v1771_v63  ;;  %1705 = vmatprep.subr.bf16.mxu1 %v1779_v38 }
  0x46   : > { %1684 = vmatpush3.bf16.msra.mxu0 %v1772_v48  ;;  %1687 = vmatprep.mubr.msk.bf16.mxu0 %vm320_vm0, %v1550_v1 }
  0x47   : > { %1685 = vmatprep.subr.bf16.mxu0 %v1773_v6 }
  0x48   : > { %1706 = vmatpush3.bf16.msra.mxu1 %v1779_v38 }
  0x4a   : > { %1686 = vmatpush3.bf16.msra.mxu0 %v1773_v6 }
  0x4b   : > { %1691 = vmatprep.subr.bf16.mxu0 %v1774_v13 }
  0x51   : > { %1688 = vmatmul.mubr.msk.bf16.vlgmr.msra.gmra.mrb[0].mxu0 %vm320_vm0, %v1551_v21 }
  0x52   : > { %1692 = vmatpush3.bf16.msra.mxu0 %v1774_v13  ;;  %1695 = vmatprep.mubr.msk.bf16.mxu0 %vm320_vm0, %v1568_v22 }
  0x53   : > { %1693 = vmatprep.subr.bf16.mxu0 %v1775_v32 }
  0x56   : > { %1694 = vmatpush3.bf16.msra.mxu0 %v1775_v32 }
  0x5d   : > { %1696 = vmatmul.mubr.msk.bf16.vlgmr.msra.gmra.mrb[0].mxu0 %vm320_vm0, %v1569_v35 }
 0x10d   : > { %v1649_v40 = vpop.f32.mrb[0].mxu1 }
 0x10e   : > { %v547_v41 = vpop.f32.mrb[1].mxu1 }
 0x10f   : > { %v1650_v42 = vpop.f32.mrb[2].mxu1 }
 0x110   : > { %v550_v44 = vpop.f32.mrb[3].mxu1 }
 0x130   : > { %v1697_v10 = vpop.f32.mrb[0].mxu0 }
 0x131   : > { %v1711_v46 = vadd.f32 %v1697_v10, %v1649_v40  ;;  %v1241_v47 = vpop.f32.mrb[1].mxu0 }
 0x132   : > { %v1712_v49 = vadd.f32 %v1241_v47, %v547_v41  ;;  %v1698_v48 = vpop.f32.mrb[2].mxu0 }
 0x133   : > { %v1269_v50 = vadd.f32 %v1711_v46, %v1574_v45  ;;  %v1713_v51 = vadd.f32 %v1698_v48, %v1650_v42  ;;  %v1244_v43 = vpop.f32.mrb[3].mxu0 }
 0x134   : > { %v1267_v52 = vadd.f32 %v1712_v49, %v1574_v45  ;;  %v1714_v54 = vadd.f32 %v1244_v43, %v550_v44 }
 0x135   : > { %v1270_v11 = vadd.f32 %v1713_v51, %v1574_v45  ;;  %v1273_v56 = vmax.f32 %v1269_v50, 0.0 }
 0x136   : > { %v1268_v55 = vadd.f32 %v1714_v54, %v1574_v45  ;;  %v1271_v53 = vmax.f32 %v1267_v52, 0.0 }
 0x137   : > { %v1274_v57 = vmax.f32 %v1270_v11, 0.0 }
 0x138   : > { %v1272_v58 = vmax.f32 %v1268_v55, 0.0 }
 0x139   : > { %v1276_v60 = vpack.c.bf16 %v1274_v57, %v1273_v56 }
 0x13a   : > { %v1275_v26 = vpack.c.bf16 %v1272_v58, %v1271_v53 }
 0x13c   : > { %1707 = vmatprep.mubr.msk.bf16.mxu1 %vm1316_vm7, %v1275_v26 }
 0x13d   : > { %1708 = vmatmul.mubr.msk.bf16.vlgmr.msra.gmra.mrb[4].mxu1 %vm1316_vm7, %v1276_v60 }
 0x210   : > { %v1709_v61 = vpop.f32.mrb[4].mxu1 }
 0x211   : > { %v1366_v62 = vadd.f32 %v1709_v61, %v1575_v27  ;;  %v1357_v63 = vpop.f32.mrb[5].mxu1 }
 0x212   : > { %v1358_v0 = vadd.f32 %v1575_v27, %v1357_v63  ;;  %v1710_v1 = vpop.f32.mrb[6].mxu1 }
 0x213   : > { %v1374_v2 = vpack.c.bf16 %v1366_v62, %v1366_v62  ;;  %v1369_v3 = vadd.f32 %v1710_v1, %v1575_v27  ;;  %v1360_v4 = vpop.f32.mrb[7].mxu1 }
 0x214   : > { %v1372_v6 = vpack.c.bf16 %v1358_v0, %v1358_v0  ;;  %v1361_v7 = vadd.f32 %v1575_v27, %v1360_v4 }
 0x215   : > { %1379 = vst.msk [vmem:[%s224_s29 + $0x8] sm:$0xf] %vm1376_vm8, %v1374_v2  ;;  %v1375_v8 = vpack.c.bf16 %v1369_v3, %v1369_v3 }
 0x216   : > { %1377 = vst.msk [vmem:[%s224_s29] sm:$0xf] %vm1376_vm8, %v1372_v6  ;;  %v1373_v9 = vpack.c.bf16 %v1361_v7, %v1361_v7 }
 0x217   : > { %1380 = vst.msk [vmem:[%s224_s29 + $0xc] sm:$0xf] %vm1376_vm8, %v1375_v8 }
 0x218   : > { %1378 = vst.msk [vmem:[%s224_s29 + $0x4] sm:$0xf] %vm1376_vm8, %v1373_v9 }
 0x219 PF: > { %s15_s18 = sadd.s32 1, %s1786_s18  }
 0x21a   : > { %p12_p4 = scmp.ge.s32.totalorder %s15_s18, 4  }
 0x21c   :  { %14 = sbr.rel (!%p12_p4) target bundleno = 1 (0x1), region = 80 }

// kernel: multi_task_forward.7
= control target key start
LH: loop header
LB: loop body
LE: loop exit
PB: predicated region body
PF: predicated region fallthrough
CT: control target
= control target key end

     0   :  { %s581_s12 = smov 0   ;;  %s583_s13 = smov 0   ;;  %s658_s0 = inlined_call_operand.vmem [shape: f32[16,4], index: 0, kind: input, shape index: {}]   ;;  %s659_s1 = inlined_call_operand.vmem [shape: bf16[4,48], index: 1, kind: input, shape index: {}]   ;;  %s660_s2 = inlined_call_operand.vmem [shape: f32[48,192], index: 2, kind: input, shape index: {}]   ;;  %s661_s3 = inlined_call_operand.vmem [shape: f32[16,192], index: 3, kind: output, shape index: {}]  }
   0x1   :  { %s585_s14 = smov 0  }
   0x2 LB: > { %s25_s15 = sadd.s32 1, %s553_s13  ;;  %p480_p0 = scmp.ge.s32.totalorder %s557_s14, 1  ;;  %s557_s14 = sphi %s585_s14, %s13_s14   ;;  %s553_s13 = sphi %s583_s13, %s663_s13   ;;  %s549_s12 = sphi %s581_s12, %s662_s12  }
   0x3   : > { %p27_p1 = scmp.ge.s32.totalorder %s25_s15, 2  ;;  %p159_p2 = scmp.lt.s32.totalorder %s557_s14, 3 }
   0x5   : > { %s665_s15 = smov (%p27_p1, %s25_s15), 0  ;;  %p160_p3 = pnand %p480_p0, %p159_p2 }
   0x6   : > { %v209_v0 = vld [vmem:[%s659_s1] sm:$0x3] (!%p160_p3)  ;;  %vm215_vm0 = vcmask (!%p160_p3), 1043456   ;;  %p190_p4 = scmp.lt.s32.totalorder (!%p160_p3), %s549_s12, 1  ;;  %v559_v1 = vmov (!%p160_p3), 0.0   ;;  %vm560_vm1 = vmmov (!%p160_p3), 0  }
   0x7   : > { %163 = sbr.rel (%p160_p3) target bundleno = 444 (0x1bc), region = 32  ;;  %492 = vmatprep.subr.mxu0 (!%p160_p3), %v559_v1  ;;  %v210_v2 = vunpack.c.l.bf16 (!%p160_p3), %v209_v0  ;;  %494 = vmatprep.mubr.msk.f32.mxu0 (!%p160_p3), %vm560_vm1, %v559_v1  ;;  %v290_v3 = vld [vmem:[%s660_s2 + $0x8] sm:$0xff] (!%p160_p3)  ;;  %v292_v4 = vld [vmem:[%s660_s2 + $0x18] sm:$0xff] (!%p160_p3)  ;;  %v289_v5 = vld [vmem:[%s660_s2] sm:$0xff] (!%p160_p3)  ;;  %vm211_vm2 = vcmask (!%p160_p3), 31744   ;;  %vm301_vm3 = vcmask (!%p160_p3), 392192  }
   0x8   : > { %v497_v6 = vpack.c.bf16 (!%p160_p3), %v292_v4, %v290_v3  ;;  %v291_v7 = vld [vmem:[%s660_s2 + $0x10] sm:$0xff] (!%p160_p3)  ;;  %v294_v8 = vld [vmem:[%s660_s2 + $0x28] sm:$0xff] (!%p160_p3)  ;;  %v296_v9 = vld [vmem:[%s660_s2 + $0x38] sm:$0xff] (!%p160_p3)  ;;  %369 = vmatprep.mubr.f32.mxu1 (!%p160_p3), %v559_v1  ;;  %vm377_vm4 = vcmask (!%p160_p3), 523264  }
   0x9   : > { %493 = vmatpush3.msk.msra.mxu0 (!%p160_p3), %vm215_vm0, %v210_v2  ;;  %v499_v10 = vpack.c.bf16 (!%p160_p3), %v291_v7, %v289_v5  ;;  %v501_v11 = vpack.c.bf16 (!%p160_p3), %v296_v9, %v294_v8  ;;  %v293_v12 = vld [vmem:[%s660_s2 + $0x20] sm:$0xff] (!%p160_p3)  ;;  %v295_v13 = vld [vmem:[%s660_s2 + $0x30] sm:$0xff] (!%p160_p3)  ;;  %v298_v14 = vld [vmem:[%s660_s2 + $0x48] sm:$0xff] (!%p160_p3) }
   0xa   : > { %498 = vmatprep.subr.bf16.mxu1 (!%p160_p3), %v497_v6  ;;  %v300_v15 = vld [vmem:[%s660_s2 + $0x58] sm:$0xff] (!%p160_p3)  ;;  %v503_v16 = vpack.c.bf16 (!%p160_p3), %v295_v13, %v293_v12  ;;  %v297_v19 = vld [vmem:[%s660_s2 + $0x40] sm:$0xff] (!%p160_p3)  ;;  %v299_v20 = vld [vmem:[%s660_s2 + $0x50] sm:$0xff] (!%p160_p3) }
   0xb   : > { %500 = vmatpush1.bf16.msra.mxu1 (!%p160_p3), %v499_v10  ;;  %v505_v18 = vpack.c.bf16 (!%p160_p3), %v300_v15, %v298_v14  ;;  %v507_v21 = vpack.c.bf16 (!%p160_p3), %v299_v20, %v297_v19 }
   0xc   : > { %502 = vmatprep.subr.bf16.mxu1 (!%p160_p3), %v501_v11 }
   0xe   : > { %s667_s12 = smov (!%p190_p4, %s549_s12), 1 }
   0xf   : > { %s481_s9 = sshll.u32 %s667_s12, 3  ;;  %504 = vmatpush1.bf16.msra.mxu1 %v503_v16  ;;  %s489_s23 = sshll.u32 %s667_s12, 4 }
  0x10   : > { %s193_s18 = scalar_lea.vmem %s658_s0, %s481_s9  ;;  %506 = vmatprep.subr.bf16.mxu1 %v505_v18  ;;  %s206_s26 = scalar_lea.vmem %s661_s3, %s489_s23 }
  0x11   : > { %v208_v17 = vld [vmem:[%s193_s18] sm:$0xff] }
  0x12   : > { %495 = vmatmul.mubr.msk.f32.vlgmr.msra.gmra.mrb[0].mxu0 %vm211_vm2, %v208_v17 }
  0x13   : > { %508 = vmatpush1.bf16.msra.mxu1 %v507_v21 }
  0xe5   : > { %v285_v22 = vpop.f32.mrb[0].mxu0 }
  0xe6   : > { %v496_v23 = vpop.f32.mrb[1].mxu0  ;;  %486 = vmatmul.mubr.msk.f32.vlgmr.msra.gmra.mrb[0].mxu1 %vm301_vm3, %v285_v22 }
 0x1b9   : > { %v371_v24 = vpop.f32.mrb[0].mxu1 }
 0x1ba   : > { %376 = vst [vmem:[%s206_s26] sm:$0xff] %v371_v24  ;;  %v373_v25 = vpop.f32.mrb[1].mxu1 }
 0x1bb   : > { %378 = vst.msk [vmem:[%s206_s26 + $0x8] sm:$0xff] %vm377_vm4, %v373_v25 }
 0x1bc PF: > { %s13_s14 = sadd.s32 1, %s557_s14   ;;  %s662_s12 = smov %s553_s13 }
 0x1bd   : > { %p10_p5 = scmp.ge.s32.totalorder %s13_s14, 4   ;;  %s663_s13 = smov %s665_s15 }
 0x1bf   :  { %12 = sbr.rel (!%p10_p5) target bundleno = 2 (0x2), region = 65 }

// kernel: multi_task_forward.4
= control target key start
LH: loop header
LB: loop body
LE: loop exit
PB: predicated region body
PF: predicated region fallthrough
CT: control target
= control target key end

     0   :  { %s2094_s12 = smov 0   ;;  %s2373_s0 = inlined_call_operand.vmem [shape: bf16[2,4,9,9,4], index: 0, kind: input, shape index: {}]   ;;  %s2374_s1 = inlined_call_operand.vmem [shape: bf16[9,4,16], index: 1, kind: input, shape index: {}]   ;;  %s2375_s2 = inlined_call_operand.vmem [shape: f32[1,16], index: 2, kind: input, shape index: {}]   ;;  %s2376_s3 = inlined_call_operand.vmem [shape: bf16[2,8,8,16], index: 3, kind: output, shape index: {}]  }
   0x1 LB: > { %s1658_s13 = sadd.s32 4294967295, %s2072_s12   ;;  %p1662_p0 = scmp.ge.s32.totalorder %s2072_s12, 1  ;;  %s2072_s12 = sphi %s2094_s12, %s13_s12  }
   0x2   : > { %p137_p1 = scmp.lt.s32.totalorder %s2072_s12, 3 }
   0x4   : > { %p138_p2 = pnand %p1662_p0, %p137_p1 }
   0x5   : > { %v1674_v0 = vld [vmem:[%s2374_s1 + $0x2] sm:$0x3] (!%p138_p2)  ;;  %vm225_vm0 = vcmask (!%p138_p2), 1041408   ;;  %v2108_v1 = vld [vmem:[%s2374_s1 + $0x8] sm:$0x3] (!%p138_p2)  ;;  %p161_p3 = scmp.lt.s32.totalorder (!%p138_p2), %s1658_s13, 1 }
   0x6   : > { %141 = sbr.rel (%p138_p2) target bundleno = 318 (0x13e), region = 32  ;;  %2023 = vmatprep.subr.msk.bf16.mxu1 (!%p138_p2), %vm225_vm0, %v1674_v0  ;;  %2027 = vmatprep.subr.msk.bf16.mxu0 (!%p138_p2), %vm225_vm0, %v2108_v1  ;;  %v227_v2 = vsel (!%p138_p2), %vm225_vm0, %v1674_v0, 0  ;;  %v2116_v3 = vsel (!%p138_p2), %vm225_vm0, %v2108_v1, 0  ;;  %v180_v4 = vld [vmem:[%s2374_s1] sm:$0x3] (!%p138_p2)  ;;  %vm212_vm1 = vcmask (!%p138_p2), 31744  }
   0x7   : > { %1868 = vmatpush3.bf16.msra.mxu1 (!%p138_p2), %v227_v2  ;;  %1908 = vmatpush3.bf16.msra.mxu0 (!%p138_p2), %v2116_v3  ;;  %v1750_v5 = vld [vmem:[%s2374_s1 + $0xa] sm:$0x3] (!%p138_p2)  ;;  %v327_v6 = vsel (!%p138_p2), %vm225_vm0, %v180_v4, 0  ;;  %v1767_v9 = vld [vmem:[%s2374_s1 + $0xc] sm:$0x3] (!%p138_p2)  ;;  %vm1594_vm5 = vcmask (!%p138_p2), 125952  }
   0x8   : > { %2024 = vmatprep.subr.msk.bf16.mxu1 (!%p138_p2), %vm225_vm0, %v180_v4  ;;  %2029 = vmatprep.subr.msk.bf16.mxu0 (!%p138_p2), %vm225_vm0, %v1750_v5  ;;  %v1020_v7 = vsel (!%p138_p2), %vm225_vm0, %v1750_v5, 0  ;;  %v1691_v10 = vld [vmem:[%s2374_s1 + $0x4] sm:$0x3] (!%p138_p2)  ;;  %vm410_vm2 = vsmask.f32 (!%p138_p2), 3328  ;;  %v2153_v15 = vsel (!%p138_p2), %vm225_vm0, %v1767_v9, 0 }
   0x9   : > { %vm411_vm3 = vsmask.f32 (!%p138_p2), 7440  ;;  %v2156_v16 = vsel (!%p138_p2), %vm225_vm0, %v1691_v10, 0 }
   0xa   : > { %vm2173_vm4 = vmor (!%p138_p2), %vm410_vm2, %vm411_vm3 }
   0xd   : > { %s2380_s13 = smov (!%p161_p3, %s1658_s13), 1 }
   0xe   : > { %s2033_s22 = smul.u32 288, %s2380_s13  ;;  %s1821_s11 = sshll.u32 %s2380_s13, 5 }
   0xf   : > { %s2352_s16 = scalar_lea.vmem %s2376_s3, %s1821_s11 }
  0x10   : > { %s2133_s25 = scalar_lea.vmem %s2373_s0, %s2033_s22 }
  0x11   : > { %v2042_v8 = vld [vmem:[%s2133_s25 + $0x48] ss:$8 sps:$4 sm:$0xff]   ;;  %v2043_v11 = vld [vmem:[%s2133_s25 + $0xd8] ss:$8 sps:$4 sm:$0xff]   ;;  %v1735_v19 = vld [vmem:[%s2133_s25 + $0x94] sm:$0x1] }
  0x12   : > { %1869 = vmatprep.mubr.msk.bf16.mxu1 %vm212_vm1, %v2042_v8  ;;  %v2044_v12 = vld [vmem:[%s2133_s25 + $0x58] ss:$8 sps:$4 sm:$0xff]   ;;  %1909 = vmatprep.mubr.msk.bf16.mxu0 %vm212_vm1, %v2043_v11  ;;  %v2045_v13 = vld [vmem:[%s2133_s25 + $0xe8] ss:$8 sps:$4 sm:$0xff]   ;;  %v1737_v21 = vld [vmem:[%s2133_s25 + $0x9c] sm:$0x1] }
  0x13   : > { %1870 = vmatmul.mubr.msk.bf16.vlgmr.msra.gmra.mrb[0].mxu1 %vm212_vm1, %v2044_v12  ;;  %v2046_v14 = vld [vmem:[%s2133_s25 + $0x68] ss:$8 sps:$4 sm:$0xff]   ;;  %1910 = vmatmul.mubr.msk.bf16.vlgmr.msra.gmra.mrb[0].mxu0 %vm212_vm1, %v2045_v13  ;;  %v2047_v17 = vld [vmem:[%s2133_s25 + $0x78] ss:$8 sps:$4 sm:$0xff]   ;;  %v891_v24 = vshll.u32 %v1735_v19, 16  ;;  %v905_v27 = vshll.u32 %v1737_v21, 16 }
  0x14   : > { %1878 = vmatpush3.bf16.msra.mxu1 %v327_v6  ;;  %1918 = vmatpush3.bf16.msra.mxu0 %v1020_v7  ;;  %v1734_v18 = vld [vmem:[%s2133_s25 + $0x90] sm:$0xf]  ;;  %v1736_v20 = vld [vmem:[%s2133_s25 + $0x98] sm:$0xf]  ;;  %v1738_v28 = vld [vmem:[%s2133_s25 + $0xa0] sm:$0xf] }
  0x15   : > { %1873 = vmatprep.mubr.msk.bf16.mxu1 %vm212_vm1, %v2046_v14  ;;  %v882_v22 = vshrl.u32 %v1734_v18, 16  ;;  %v885_v23 = vshll.u32 %v1734_v18, 16  ;;  %v896_v25 = vshrl.u32 %v1736_v20, 16  ;;  %2030 = vmatprep.subr.msk.bf16.mxu0 %vm225_vm0, %v1767_v9  ;;  %v899_v26 = vshll.u32 %v1736_v20, 16  ;;  %v1739_v29 = vld [vmem:[%s2133_s25 + $0xa4] sm:$0x1] }
  0x16   : > { %2025 = vmatprep.subr.msk.bf16.mxu1 %vm225_vm0, %v1691_v10  ;;  %v893_v32 = vrot.slane %v891_v24, 5  ;;  %v1740_v34 = vld [vmem:[%s2133_s25 + $0xa8] sm:$0xf]  ;;  %v907_v36 = vrot.slane %v905_v27, 5  ;;  %v1741_v37 = vld [vmem:[%s2133_s25 + $0xac] sm:$0x1] }
  0x17   : > { %v884_v30 = vrot.slane %v882_v22, 4  ;;  %v887_v31 = vrot.slane %v885_v23, 5  ;;  %v898_v33 = vrot.slane %v896_v25, 4  ;;  %v901_v35 = vrot.slane %v899_v26, 5  ;;  %v2048_v53 = vld [vmem:[%s2133_s25] ss:$8 sps:$4 sm:$0xff]  }
  0x18   : > { %v910_v38 = vshrl.u32 %v1738_v28, 16  ;;  %v913_v39 = vshll.u32 %v1738_v28, 16  ;;  %v919_v41 = vshll.u32 %v1739_v29, 16  ;;  %v924_v42 = vshrl.u32 %v1740_v34, 16  ;;  %v2049_v59 = vld [vmem:[%s2133_s25 + $0x10] ss:$8 sps:$4 sm:$0xff]  }
  0x19   : > { %v888_v40 = vor.u32 %v887_v31, %v884_v30  ;;  %v927_v43 = vshll.u32 %v1740_v34, 16  ;;  %v902_v45 = vor.u32 %v901_v35, %v898_v33  ;;  %v933_v48 = vshll.u32 %v1741_v37, 16  ;;  %v1742_v60 = vld [vmem:[%s2133_s25 + $0xb0] sm:$0xf]  ;;  %v1743_v61 = vld [vmem:[%s2133_s25 + $0xb4] sm:$0x1] }
  0x1a   : > { %v912_v46 = vrot.slane %v910_v38, 4  ;;  %v915_v47 = vrot.slane %v913_v39, 5  ;;  %v921_v50 = vrot.slane %v919_v41, 5  ;;  %v926_v51 = vrot.slane %v924_v42, 4  ;;  %v1744_v0 = vld [vmem:[%s2133_s25 + $0xb8] sm:$0xf] }
  0x1b   : > { %1874 = vmatmul.mubr.msk.bf16.gmra.mrb[4].mxu1 %vm212_vm1, %v2047_v17  ;;  %v889_v49 = vrot.slane %v888_v40, 4  ;;  %v929_v52 = vrot.slane %v927_v43, 5  ;;  %v903_v54 = vrot.slane %v902_v45, 4  ;;  %v935_v56 = vrot.slane %v933_v48, 5  ;;  %v1745_v2 = vld [vmem:[%s2133_s25 + $0xbc] sm:$0x1] }
  0x1c   : > { %v916_v55 = vor.u32 %v915_v47, %v912_v46  ;;  %1879 = vmatprep.mubr.msk.bf16.mxu1 %vm212_vm1, %v2048_v53  ;;  %v938_v4 = vshrl.u32 %v1742_v60, 16  ;;  %v941_v7 = vshll.u32 %v1742_v60, 16  ;;  %v947_v8 = vshll.u32 %v1743_v61, 16  ;;  %v1746_v9 = vld [vmem:[%s2133_s25 + $0xc0] sm:$0xf] }
  0x1d   : > { %v894_v57 = vsel %vm2173_vm4, %v889_v49, %v893_v32  ;;  %v930_v58 = vor.u32 %v929_v52, %v926_v51  ;;  %v908_v62 = vsel %vm2173_vm4, %v903_v54, %v907_v36  ;;  %v2192_v10 = vld [vmem:[%s2374_s1 + $0x6] sm:$0x3]  ;;  %v952_v13 = vshrl.u32 %v1744_v0, 16  ;;  %v1747_v17 = vld [vmem:[%s2133_s25 + $0xc4] sm:$0x1] }
  0x1e   : > { %v917_v63 = vrot.slane %v916_v55, 4  ;;  %v1751_v5 = vcombine.low %v894_v57, %v908_v62  ;;  %v940_v12 = vrot.slane %v938_v4, 4  ;;  %v955_v14 = vshll.u32 %v1744_v0, 16  ;;  %v1748_v22 = vld [vmem:[%s2133_s25 + $0xc8] sm:$0xf] }
  0x1f   : > { %v931_v6 = vrot.slane %v930_v58, 4  ;;  %v943_v19 = vrot.slane %v941_v7, 5  ;;  %v949_v20 = vrot.slane %v947_v8, 5  ;;  %v961_v21 = vshll.u32 %v1745_v2, 16  ;;  %v2204_v23 = vld [vmem:[%s2374_s1 + $0xe] sm:$0x3] }
  0x20   : > { %v922_v11 = vsel %vm2173_vm4, %v917_v63, %v921_v50  ;;  %1919 = vmatprep.mubr.msk.bf16.mxu0 %vm212_vm1, %v1751_v5  ;;  %v954_v25 = vrot.slane %v952_v13, 4  ;;  %v957_v26 = vrot.slane %v955_v14, 5  ;;  %v1749_v27 = vld [vmem:[%s2133_s25 + $0xcc] sm:$0x1]  ;;  %v966_v28 = vshrl.u32 %v1746_v9, 16 }
  0x21   : > { %v936_v18 = vsel %vm2173_vm4, %v931_v6, %v935_v56  ;;  %v944_v29 = vor.u32 %v943_v19, %v940_v12  ;;  %v963_v30 = vrot.slane %v961_v21, 5  ;;  %v969_v31 = vshll.u32 %v1746_v9, 16  ;;  %v2052_v53 = vld [vmem:[%s2133_s25 + $0x8] ss:$8 sps:$4 sm:$0xff]   ;;  %v394_v54 = vld [vmem:[%s2133_s25] sm:$0xf] }
  0x22   : > { %v1752_v24 = vcombine.low %v922_v11, %v936_v18  ;;  %v975_v32 = vshll.u32 %v1747_v17, 16  ;;  %v958_v33 = vor.u32 %v957_v26, %v954_v25  ;;  %v968_v34 = vrot.slane %v966_v28, 4  ;;  %v395_v56 = vld [vmem:[%s2133_s25 + $0x4] sm:$0x1]  ;;  %v396_v57 = vld [vmem:[%s2133_s25 + $0x8] sm:$0xf] }
  0x23   : > { %1880 = vmatmul.mubr.msk.bf16.vlgmr.msra.gmra.mrb[0].mxu1 %vm212_vm1, %v2049_v59  ;;  %v980_v35 = vshrl.u32 %v1748_v22, 16  ;;  %v983_v36 = vshll.u32 %v1748_v22, 16  ;;  %v945_v37 = vrot.slane %v944_v29, 4  ;;  %v971_v38 = vrot.slane %v969_v31, 5  ;;  %v397_v58 = vld [vmem:[%s2133_s25 + $0xc] sm:$0x1] }
  0x24   : > { %1888 = vmatpush3.bf16.msra.mxu1 %v2156_v16  ;;  %1920 = vmatmul.mubr.msk.bf16.vlgmr.msra.gmra.mrb[0].mxu0 %vm212_vm1, %v1752_v24  ;;  %v989_v39 = vshll.u32 %v1749_v27, 16  ;;  %v2050_v16 = vld [vmem:[%s2133_s25 + $0x20] ss:$8 sps:$4 sm:$0xff]   ;;  %v959_v40 = vrot.slane %v958_v33, 4  ;;  %v977_v46 = vrot.slane %v975_v32, 5  ;;  %v414_v60 = vshrl.u32 %v394_v54, 16 }
  0x25   : > { %2026 = vmatprep.subr.msk.bf16.mxu1 %vm225_vm0, %v2192_v10  ;;  %1928 = vmatpush3.bf16.msra.mxu0 %v2153_v15  ;;  %v982_v41 = vrot.slane %v980_v35, 4  ;;  %v985_v42 = vrot.slane %v983_v36, 5  ;;  %v950_v43 = vsel %vm2173_vm4, %v945_v37, %v949_v20  ;;  %v972_v45 = vor.u32 %v971_v38, %v968_v34  ;;  %v2051_v15 = vld [vmem:[%s2133_s25 + $0x30] ss:$8 sps:$4 sm:$0xff]   ;;  %v399_v6 = vld [vmem:[%s2133_s25 + $0x14] sm:$0x1] }
  0x26   : > { %2031 = vmatprep.subr.msk.bf16.mxu0 %vm225_vm0, %v2204_v23  ;;  %1883 = vmatprep.mubr.msk.bf16.mxu1 %vm212_vm1, %v2050_v16  ;;  %v964_v47 = vsel %vm2173_vm4, %v959_v40, %v963_v30  ;;  %v991_v49 = vrot.slane %v989_v39, 5  ;;  %v417_v61 = vshll.u32 %v394_v54, 16  ;;  %v423_v62 = vshll.u32 %v395_v56, 16  ;;  %v398_v63 = vld [vmem:[%s2133_s25 + $0x10] sm:$0xf] }
  0x27   : > { %v986_v48 = vor.u32 %v985_v42, %v982_v41  ;;  %v1753_v50 = vcombine.low %v950_v43, %v964_v47  ;;  %v973_v51 = vrot.slane %v972_v45, 4  ;;  %v428_v2 = vshrl.u32 %v396_v57, 16  ;;  %v400_v11 = vld [vmem:[%s2133_s25 + $0x18] sm:$0xf]  ;;  %v401_v18 = vld [vmem:[%s2133_s25 + $0x1c] sm:$0x1] }
  0x28   : > { %v431_v4 = vshll.u32 %v396_v57, 16  ;;  %v437_v5 = vshll.u32 %v397_v58, 16  ;;  %v416_v7 = vrot.slane %v414_v60, 4  ;;  %v419_v8 = vrot.slane %v417_v61, 5  ;;  %v2053_v29 = vld [vmem:[%s2133_s25 + $0x18] ss:$8 sps:$4 sm:$0xff]  }
  0x29   : > { %v987_v52 = vrot.slane %v986_v48, 4  ;;  %1923 = vmatprep.mubr.msk.bf16.mxu0 %vm212_vm1, %v1753_v50  ;;  %v978_v55 = vsel %vm2173_vm4, %v973_v51, %v977_v46  ;;  %v425_v9 = vrot.slane %v423_v62, 5  ;;  %v442_v12 = vshrl.u32 %v398_v63, 16  ;;  %v2054_v37 = vld [vmem:[%s2133_s25 + $0x28] ss:$8 sps:$4 sm:$0xff]  }
  0x2a   : > { %v430_v13 = vrot.slane %v428_v2, 4  ;;  %v433_v14 = vrot.slane %v431_v4, 5  ;;  %v439_v17 = vrot.slane %v437_v5, 5  ;;  %v445_v19 = vshll.u32 %v398_v63, 16  ;;  %v402_v40 = vld [vmem:[%s2133_s25 + $0x20] sm:$0xf] }
  0x2b   : > { %1884 = vmatmul.mubr.msk.bf16.gmra.mrb[4].mxu1 %vm212_vm1, %v2051_v15  ;;  %v992_v59 = vsel %vm2173_vm4, %v987_v52, %v991_v49  ;;  %v420_v20 = vor.u32 %v419_v8, %v416_v7  ;;  %v444_v21 = vrot.slane %v442_v12, 4  ;;  %v451_v22 = vshll.u32 %v399_v6, 16  ;;  %v403_v45 = vld [vmem:[%s2133_s25 + $0x24] sm:$0x1]  ;;  %v404_v46 = vld [vmem:[%s2133_s25 + $0x28] sm:$0xf] }
  0x2c   : > { %v1754_v0 = vcombine.low %v978_v55, %v992_v59  ;;  %v456_v24 = vshrl.u32 %v400_v11, 16  ;;  %v434_v25 = vor.u32 %v433_v14, %v430_v13  ;;  %v447_v26 = vrot.slane %v445_v19, 5  ;;  %v405_v48 = vld [vmem:[%s2133_s25 + $0x2c] sm:$0x1]  ;;  %v406_v55 = vld [vmem:[%s2133_s25 + $0x30] sm:$0xf] }
  0x2d   : > { %v459_v27 = vshll.u32 %v400_v11, 16  ;;  %v465_v28 = vshll.u32 %v401_v18, 16  ;;  %v1258_v30 = vsel %vm225_vm0, %v2204_v23, 0  ;;  %v421_v31 = vrot.slane %v420_v20, 4  ;;  %v2251_v23 = vld [vmem:[%s2374_s1 + $0x10] sm:$0x3] }
  0x2e   : > { %1924 = vmatmul.mubr.msk.bf16.gmra.mrb[4].mxu0 %vm212_vm1, %v1754_v0  ;;  %v453_v32 = vrot.slane %v451_v22, 5  ;;  %v458_v33 = vrot.slane %v456_v24, 4  ;;  %v435_v34 = vrot.slane %v434_v25, 4  ;;  %v448_v35 = vor.u32 %v447_v26, %v444_v21  ;;  %v407_v60 = vld [vmem:[%s2133_s25 + $0x34] sm:$0x1] }
  0x2f   : > { %1929 = vmatprep.mubr.msk.bf16.mxu0 %vm212_vm1, %v2052_v53  ;;  %v461_v36 = vrot.slane %v459_v27, 5  ;;  %v426_v38 = vsel %vm2173_vm4, %v421_v31, %v425_v9  ;;  %v467_v39 = vrot.slane %v465_v28, 5  ;;  %v671_v16 = vsel %vm225_vm0, %v2192_v10, 0  ;;  %v2055_v62 = vld [vmem:[%s2133_s25 + $0x38] ss:$8 sps:$4 sm:$0xff]  }
  0x30   : > { %v440_v41 = vsel %vm2173_vm4, %v435_v34, %v439_v17  ;;  %v449_v42 = vrot.slane %v448_v35, 4  ;;  %v470_v15 = vshrl.u32 %v402_v40, 16  ;;  %v473_v49 = vshll.u32 %v402_v40, 16  ;;  %v408_v0 = vld [vmem:[%s2133_s25 + $0x38] sm:$0xf] }
  0x31   : > { %v462_v43 = vor.u32 %v461_v36, %v458_v33  ;;  %v1692_v47 = vcombine.low %v426_v38, %v440_v41  ;;  %v479_v10 = vshll.u32 %v403_v45, 16  ;;  %v484_v50 = vshrl.u32 %v404_v46, 16  ;;  %v409_v2 = vld [vmem:[%s2133_s25 + $0x3c] sm:$0x1]  ;;  %v2056_v14 = vld [vmem:[%s2133_s25 + $0x50] ss:$8 sps:$4 sm:$0xff]  }
  0x32   : > { %v454_v51 = vsel %vm2173_vm4, %v449_v42, %v453_v32  ;;  %v472_v53 = vrot.slane %v470_v15, 4  ;;  %v487_v54 = vshll.u32 %v404_v46, 16  ;;  %v475_v56 = vrot.slane %v473_v49, 5  ;;  %v2057_v35 = vld [vmem:[%s2133_s25 + $0x60] ss:$8 sps:$4 sm:$0xff]  }
  0x33   : > { %v463_v52 = vrot.slane %v462_v43, 4  ;;  %1889 = vmatprep.mubr.msk.bf16.mxu1 %vm212_vm1, %v1692_v47  ;;  %v481_v57 = vrot.slane %v479_v10, 5  ;;  %v486_v58 = vrot.slane %v484_v50, 4  ;;  %v493_v59 = vshll.u32 %v405_v48, 16  ;;  %v1794_v40 = vld [vmem:[%s2133_s25 + $0xc] sm:$0x1] }
  0x34   : > { %v489_v63 = vrot.slane %v487_v54, 5  ;;  %v498_v4 = vshrl.u32 %v406_v55, 16  ;;  %v476_v6 = vor.u32 %v475_v56, %v472_v53  ;;  %v501_v8 = vshll.u32 %v406_v55, 16  ;;  %v1795_v41 = vld [vmem:[%s2133_s25 + $0x10] sm:$0xf] }
  0x35   : > { %v468_v61 = vsel %vm2173_vm4, %v463_v52, %v467_v39  ;;  %v495_v7 = vrot.slane %v493_v59, 5  ;;  %v507_v12 = vshll.u32 %v407_v60, 16  ;;  %v512_v13 = vshrl.u32 %v408_v0, 16  ;;  %v2060_v39 = vld [vmem:[%s2133_s25 + $0x70] ss:$8 sps:$4 sm:$0xff]  }
  0x36   : > { %1930 = vmatmul.mubr.msk.bf16.vlgmr.msra.gmra.mrb[0].mxu0 %vm212_vm1, %v2053_v29  ;;  %v1693_v5 = vcombine.low %v454_v51, %v468_v61  ;;  %v490_v9 = vor.u32 %v489_v63, %v486_v58  ;;  %v500_v11 = vrot.slane %v498_v4, 4  ;;  %v477_v17 = vrot.slane %v476_v6, 4  ;;  %v1796_v42 = vld [vmem:[%s2133_s25 + $0x14] sm:$0x1]  ;;  %v1797_v48 = vld [vmem:[%s2133_s25 + $0x18] sm:$0xf] }
  0x37   : > { %1938 = vmatpush3.bf16.msra.mxu0 %v1258_v30  ;;  %1933 = vmatprep.mubr.msk.bf16.mxu0 %vm212_vm1, %v2054_v37  ;;  %v503_v18 = vrot.slane %v501_v8, 5  ;;  %v515_v19 = vshll.u32 %v408_v0, 16  ;;  %v521_v20 = vshll.u32 %v409_v2, 16  ;;  %v514_v22 = vrot.slane %v512_v13, 4  ;;  %v2058_v37 = vld [vmem:[%s2133_s25 + $0x90] ss:$8 sps:$4 sm:$0xff]  }
  0x38   : > { %2032 = vmatprep.subr.msk.bf16.mxu0 %vm225_vm0, %v2251_v23  ;;  %1890 = vmatmul.mubr.msk.bf16.vlgmr.msra.gmra.mrb[0].mxu1 %vm212_vm1, %v1693_v5  ;;  %v491_v21 = vrot.slane %v490_v9, 4  ;;  %v482_v24 = vsel %vm2173_vm4, %v477_v17, %v481_v57  ;;  %v509_v26 = vrot.slane %v507_v12, 5  ;;  %v1488_v34 = vsel %vm225_vm0, %v2251_v23, 0  ;;  %v1798_v50 = vld [vmem:[%s2133_s25 + $0x1c] sm:$0x1] }
  0x39   : > { %1898 = vmatpush3.bf16.msra.mxu1 %v671_v16  ;;  %v504_v25 = vor.u32 %v503_v18, %v500_v11  ;;  %v517_v27 = vrot.slane %v515_v19, 5  ;;  %v523_v32 = vrot.slane %v521_v20, 5  ;;  %v1793_v16 = vld [vmem:[%s2133_s25 + $0x8] sm:$0xf]  ;;  %v1359_v23 = vshll.u32 %v1794_v40, 16 }
  0x3a   : > { %2028 = vmatprep.subr.msk.bf16.mxu1 %vm225_vm0, %v2108_v1  ;;  %v496_v28 = vsel %vm2173_vm4, %v491_v21, %v495_v7  ;;  %v1350_v43 = vshrl.u32 %v1793_v16, 16  ;;  %v1353_v45 = vshll.u32 %v1793_v16, 16  ;;  %v1364_v46 = vshrl.u32 %v1795_v41, 16  ;;  %v1799_v51 = vld [vmem:[%s2133_s25 + $0x20] sm:$0xf] }
  0x3b   : > { %v1694_v29 = vcombine.low %v482_v24, %v496_v28  ;;  %v505_v30 = vrot.slane %v504_v25, 4  ;;  %v518_v31 = vor.u32 %v517_v27, %v514_v22  ;;  %v1367_v15 = vshll.u32 %v1795_v41, 16  ;;  %v2059_v52 = vld [vmem:[%s2133_s25 + $0xa0] ss:$8 sps:$4 sm:$0xff]   ;;  %v1800_v58 = vld [vmem:[%s2133_s25 + $0x24] sm:$0x1] }
  0x3c   : > { %v1373_v47 = vshll.u32 %v1796_v42, 16  ;;  %v1352_v49 = vrot.slane %v1350_v43, 4  ;;  %v1355_v10 = vrot.slane %v1353_v45, 5  ;;  %v2061_v53 = vld [vmem:[%s2133_s25 + $0x80] ss:$8 sps:$4 sm:$0xff]   ;;  %v1361_v54 = vrot.slane %v1359_v23, 5 }
  0x3d   : > { %1893 = vmatprep.mubr.msk.bf16.mxu1 %vm212_vm1, %v1694_v29  ;;  %v510_v1 = vsel %vm2173_vm4, %v505_v30, %v509_v26  ;;  %v519_v33 = vrot.slane %v518_v31, 4  ;;  %v1366_v55 = vrot.slane %v1364_v46, 4  ;;  %v1369_v56 = vrot.slane %v1367_v15, 5  ;;  %v2062_v5 = vld [vmem:[%s2133_s25 + $0xb0] ss:$8 sps:$4 sm:$0xff]  }
  0x3e   : > { %1934 = vmatmul.mubr.msk.bf16.gmra.mrb[4].mxu0 %vm212_vm1, %v2055_v62  ;;  %v1375_v57 = vrot.slane %v1373_v47, 5  ;;  %v1356_v59 = vor.u32 %v1355_v10, %v1352_v49  ;;  %v1378_v60 = vshrl.u32 %v1797_v48, 16  ;;  %v1381_v61 = vshll.u32 %v1797_v48, 16  ;;  %v1801_v17 = vld [vmem:[%s2133_s25 + $0x28] sm:$0xf] }
  0x3f   : > { %1939 = vmatprep.mubr.msk.bf16.mxu0 %vm212_vm1, %v2056_v14  ;;  %v524_v36 = vsel %vm2173_vm4, %v519_v33, %v523_v32  ;;  %v1387_v62 = vshll.u32 %v1798_v50, 16  ;;  %v1370_v63 = vor.u32 %v1369_v56, %v1366_v55  ;;  %v1392_v0 = vshrl.u32 %v1799_v51, 16  ;;  %v1802_v20 = vld [vmem:[%s2133_s25 + $0x2c] sm:$0x1]  ;;  %v1803_v21 = vld [vmem:[%s2133_s25 + $0x30] sm:$0xf] }
  0x40   : > { %v1695_v38 = vcombine.low %v510_v1, %v524_v36  ;;  %v1395_v2 = vshll.u32 %v1799_v51, 16  ;;  %v1401_v4 = vshll.u32 %v1800_v58, 16  ;;  %v1357_v6 = vrot.slane %v1356_v59, 4  ;;  %v1804_v22 = vld [vmem:[%s2133_s25 + $0x34] sm:$0x1] }
  0x41   : > { %v1380_v7 = vrot.slane %v1378_v60, 4  ;;  %v1383_v8 = vrot.slane %v1381_v61, 5  ;;  %v1389_v9 = vrot.slane %v1387_v62, 5  ;;  %v1371_v11 = vrot.slane %v1370_v63, 4  ;;  %v2063_v32 = vld [vmem:[%s2133_s25 + $0xc0] ss:$8 sps:$4 sm:$0xff]  }
  0x42   : > { %1894 = vmatmul.mubr.msk.bf16.gmra.mrb[4].mxu1 %vm212_vm1, %v1695_v38  ;;  %v1394_v12 = vrot.slane %v1392_v0, 4  ;;  %v1397_v13 = vrot.slane %v1395_v2, 5  ;;  %v1403_v14 = vrot.slane %v1401_v4, 5  ;;  %v1362_v18 = vsel %vm2173_vm4, %v1357_v6, %v1361_v54  ;;  %v1805_v36 = vld [vmem:[%s2133_s25 + $0x38] sm:$0xf] }
  0x43   : > { %1899 = vmatprep.mubr.msk.bf16.mxu1 %vm212_vm1, %v2058_v37  ;;  %v1384_v19 = vor.u32 %v1383_v8, %v1380_v7  ;;  %v1376_v24 = vsel %vm2173_vm4, %v1371_v11, %v1375_v57  ;;  %v1406_v26 = vshrl.u32 %v1801_v17, 16  ;;  %v1409_v27 = vshll.u32 %v1801_v17, 16  ;;  %v1806_v16 = vld [vmem:[%s2133_s25 + $0x3c] sm:$0x1]  ;;  %v1807_v43 = vld [vmem:[%s2133_s25 + $0x40] sm:$0xf] }
  0x44   : > { %v1398_v25 = vor.u32 %v1397_v13, %v1394_v12  ;;  %v1810_v28 = vcombine.low %v1362_v18, %v1376_v24  ;;  %v1415_v30 = vshll.u32 %v1802_v20, 16  ;;  %v1420_v31 = vshrl.u32 %v1803_v21, 16  ;;  %v1808_v45 = vld [vmem:[%s2133_s25 + $0x44] sm:$0x1]  ;;  %v2064_v15 = vld [vmem:[%s2133_s25 + $0xf8] ss:$8 sps:$4 sm:$0xff]  }
  0x45   : > { %v1385_v29 = vrot.slane %v1384_v19, 4  ;;  %v1408_v33 = vrot.slane %v1406_v26, 4  ;;  %v1434_v23 = vshrl.u32 %v1805_v36, 16  ;;  %v1437_v48 = vshll.u32 %v1805_v36, 16  ;;  %v2065_v8 = vld [vmem:[%s2133_s25 + $0x108] ss:$8 sps:$4 sm:$0xff]  }
  0x46   : > { %1940 = vmatmul.mubr.msk.bf16.vlgmr.msra.gmra.mrb[0].mxu0 %vm212_vm1, %v2057_v35  ;;  %v1399_v1 = vrot.slane %v1398_v25, 4  ;;  %v1423_v35 = vshll.u32 %v1803_v21, 16  ;;  %v1417_v37 = vrot.slane %v1415_v30, 5  ;;  %v1422_v38 = vrot.slane %v1420_v31, 4  ;;  %v1818_v18 = vld [vmem:[%s2375_s2] ss:$0 sm:$0xff] }
  0x47   : > { %1948 = vmatpush3.bf16.msra.mxu0 %v1488_v34  ;;  %1943 = vmatprep.mubr.msk.bf16.mxu0 %vm212_vm1, %v2060_v39  ;;  %v1411_v34 = vrot.slane %v1409_v27, 5  ;;  %v1429_v39 = vshll.u32 %v1804_v22, 16  ;;  %v1443_v49 = vshll.u32 %v1806_v16, 16  ;;  %v1436_v51 = vrot.slane %v1434_v23, 4 }
  0x48   : > { %v1404_v40 = vsel %vm2173_vm4, %v1399_v1, %v1403_v14  ;;  %v1425_v42 = vrot.slane %v1423_v35, 5  ;;  %v1451_v54 = vshll.u32 %v1807_v43, 16  ;;  %v1457_v55 = vshll.u32 %v1808_v45, 16 }
  0x49   : > { %v1412_v41 = vor.u32 %v1411_v34, %v1408_v33  ;;  %v1431_v47 = vrot.slane %v1429_v39, 5  ;;  %v1445_v60 = vrot.slane %v1443_v49, 5 }
  0x4a   : > { %1900 = vmatmul.mubr.msk.bf16.vlgmr.msra.gmra.mrb[0].mxu1 %vm212_vm1, %v2059_v52  ;;  %v1426_v50 = vor.u32 %v1425_v42, %v1422_v38  ;;  %v1448_v52 = vshrl.u32 %v1807_v43, 16  ;;  %v1453_v61 = vrot.slane %v1451_v54, 5  ;;  %v1459_v4 = vrot.slane %v1457_v55, 5 }
  0x4b   : > { %1958 = vmatpush3.bf16.msra.mxu1 %v2116_v3  ;;  %1903 = vmatprep.mubr.msk.bf16.mxu1 %vm212_vm1, %v2062_v5  ;;  %v1390_v3 = vsel %vm2173_vm4, %v1385_v29, %v1389_v9  ;;  %v1413_v10 = vrot.slane %v1412_v41, 4 }
  0x4c   : > { %v1811_v46 = vcombine.low %v1390_v3, %v1404_v40  ;;  %v1427_v57 = vrot.slane %v1426_v50, 4  ;;  %v1450_v58 = vrot.slane %v1448_v52, 4 }
  0x4d   : > { %v1418_v56 = vsel %vm2173_vm4, %v1413_v10, %v1417_v37 }
  0x4e   : > { %1944 = vmatmul.mubr.msk.bf16.gmra.mrb[4].mxu0 %vm212_vm1, %v2061_v53  ;;  %v1439_v53 = vrot.slane %v1437_v48, 5  ;;  %v1432_v62 = vsel %vm2173_vm4, %v1427_v57, %v1431_v47  ;;  %v1454_v2 = vor.u32 %v1453_v61, %v1450_v58 }
  0x4f   : > { %1949 = vmatprep.mubr.msk.bf16.mxu0 %vm212_vm1, %v1810_v28  ;;  %v1812_v63 = vcombine.low %v1418_v56, %v1432_v62 }
  0x50   : > { %v1440_v59 = vor.u32 %v1439_v53, %v1436_v51  ;;  %v1455_v6 = vrot.slane %v1454_v2, 4 }
  0x52   : > { %1904 = vmatmul.mubr.msk.bf16.gmra.mrb[4].mxu1 %vm212_vm1, %v2063_v32  ;;  %v1441_v0 = vrot.slane %v1440_v59, 4  ;;  %v1460_v7 = vsel %vm2173_vm4, %v1455_v6, %v1459_v4 }
  0x53   : > { %1913 = vmatprep.mubr.msk.bf16.mxu1 %vm212_vm1, %v2064_v15 }
  0x54   : > { %v1446_v5 = vsel %vm2173_vm4, %v1441_v0, %v1445_v60 }
  0x55   : > { %v1813_v9 = vcombine.low %v1446_v5, %v1460_v7 }
  0x56   : > { %1950 = vmatmul.mubr.msk.bf16.vlgmr.msra.gmra.mrb[0].mxu0 %vm212_vm1, %v1811_v46 }
  0x57   : > { %1953 = vmatprep.mubr.msk.bf16.mxu0 %vm212_vm1, %v1812_v63 }
  0x5e   : > { %1954 = vmatmul.mubr.msk.bf16.gmra.mrb[4].mxu0 %vm212_vm1, %v1813_v9  ;;  %1914 = vmatmul.mubr.msk.bf16.vlgmr.msra.gmra.mrb[4].mxu1 %vm212_vm1, %v2065_v8 }
 0x11d   : > { %v1901_v11 = vpop.f32.mrb[0].mxu1 }
 0x11e   : > { %v707_v12 = vpop.f32.mrb[1].mxu1 }
 0x11f   : > { %v1902_v13 = vpop.f32.mrb[2].mxu1 }
 0x120   : > { %v710_v14 = vpop.f32.mrb[3].mxu1 }
 0x129   : > { %v1951_v17 = vpop.f32.mrb[0].mxu0 }
 0x12a   : > { %v1959_v19 = vadd.f32 %v1951_v17, %v1901_v11  ;;  %v1524_v20 = vpop.f32.mrb[1].mxu0 }
 0x12b   : > { %v1960_v44 = vadd.f32 %v1524_v20, %v707_v12  ;;  %v1952_v21 = vpop.f32.mrb[2].mxu0 }
 0x12c   : > { %v1572_v22 = vadd.f32 %v1959_v19, %v1818_v18  ;;  %v1961_v24 = vadd.f32 %v1952_v21, %v1902_v13  ;;  %v1527_v25 = vpop.f32.mrb[3].mxu0 }
 0x12d   : > { %v1570_v26 = vadd.f32 %v1960_v44, %v1818_v18  ;;  %v1962_v27 = vadd.f32 %v1527_v25, %v710_v14 }
 0x12e   : > { %v1580_v28 = vmax.f32 %v1572_v22, 0.0  ;;  %v1573_v29 = vadd.f32 %v1961_v24, %v1818_v18 }
 0x12f   : > { %v1578_v30 = vmax.f32 %v1570_v26, 0.0  ;;  %v1571_v31 = vadd.f32 %v1962_v27, %v1818_v18 }
 0x130   : > { %v1588_v32 = vpack.c.bf16 %v1580_v28, %v1580_v28  ;;  %v1581_v1 = vmax.f32 %v1573_v29, 0.0 }
 0x131   : > { %v1586_v33 = vpack.c.bf16 %v1578_v30, %v1578_v30  ;;  %v1579_v34 = vmax.f32 %v1571_v31, 0.0  ;;  %v1955_v3 = vpop.f32.mrb[4].mxu0  ;;  %v1915_v38 = vpop.f32.mrb[4].mxu1 }
 0x132   : > { %1597 = vst.msk [vmem:[%s2352_s16 + $0x8] sm:$0xf] %vm1594_vm5, %v1588_v32  ;;  %v1589_v35 = vpack.c.bf16 %v1581_v1, %v1581_v1  ;;  %v1540_v37 = vpop.f32.mrb[5].mxu0  ;;  %v1963_v16 = vadd.f32 %v1955_v3, %v1915_v38  ;;  %v842_v40 = vpop.f32.mrb[5].mxu1 }
 0x133   : > { %1595 = vst.msk [vmem:[%s2352_s16] sm:$0xf] %vm1594_vm5, %v1586_v33  ;;  %v1587_v36 = vpack.c.bf16 %v1579_v34, %v1579_v34  ;;  %v1956_v39 = vpop.f32.mrb[6].mxu0  ;;  %v1964_v42 = vadd.f32 %v1540_v37, %v842_v40  ;;  %v1916_v43 = vpop.f32.mrb[6].mxu1 }
 0x134   : > { %1598 = vst.msk [vmem:[%s2352_s16 + $0xc] sm:$0xf] %vm1594_vm5, %v1589_v35  ;;  %v1543_v41 = vpop.f32.mrb[7].mxu0  ;;  %v1576_v45 = vadd.f32 %v1963_v16, %v1818_v18  ;;  %v1965_v23 = vadd.f32 %v1956_v39, %v1916_v43  ;;  %v845_v46 = vpop.f32.mrb[7].mxu1 }
 0x135   : > { %1596 = vst.msk [vmem:[%s2352_s16 + $0x4] sm:$0xf] %vm1594_vm5, %v1587_v36  ;;  %v1574_v15 = vadd.f32 %v1964_v42, %v1818_v18  ;;  %v1966_v47 = vadd.f32 %v1543_v41, %v845_v46 }
 0x136   : > { %v1584_v48 = vmax.f32 %v1576_v45, 0.0  ;;  %v1577_v49 = vadd.f32 %v1965_v23, %v1818_v18 }
 0x137   : > { %v1582_v10 = vmax.f32 %v1574_v15, 0.0  ;;  %v1575_v50 = vadd.f32 %v1966_v47, %v1818_v18 }
 0x138   : > { %v1592_v51 = vpack.c.bf16 %v1584_v48, %v1584_v48  ;;  %v1585_v52 = vmax.f32 %v1577_v49, 0.0 }
 0x139   : > { %v1590_v53 = vpack.c.bf16 %v1582_v10, %v1582_v10  ;;  %v1583_v54 = vmax.f32 %v1575_v50, 0.0 }
 0x13a   : > { %1601 = vst.msk [vmem:[%s2352_s16 + $0x18] sm:$0xf] %vm1594_vm5, %v1592_v51  ;;  %v1593_v55 = vpack.c.bf16 %v1585_v52, %v1585_v52 }
 0x13b   : > { %1599 = vst.msk [vmem:[%s2352_s16 + $0x10] sm:$0xf] %vm1594_vm5, %v1590_v53  ;;  %v1591_v56 = vpack.c.bf16 %v1583_v54, %v1583_v54 }
 0x13c   : > { %1602 = vst.msk [vmem:[%s2352_s16 + $0x1c] sm:$0xf] %vm1594_vm5, %v1593_v55 }
 0x13d   : > { %1600 = vst.msk [vmem:[%s2352_s16 + $0x14] sm:$0xf] %vm1594_vm5, %v1591_v56 }
 0x13e PF: > { %s13_s12 = sadd.s32 1, %s2072_s12  }
 0x13f   : > { %p10_p4 = scmp.ge.s32.totalorder %s13_s12, 4  }
 0x141   :  { %12 = sbr.rel (!%p10_p4) target bundleno = 1 (0x1), region = 75 }

// kernel: multi_task_forward.5
= control target key start
LH: loop header
LB: loop body
LE: loop exit
PB: predicated region body
PF: predicated region fallthrough
CT: control target
= control target key end

     0   :  { %s1437_s12 = smov 0   ;;  %s1586_s0 = inlined_call_operand.vmem [shape: bf16[2,4,5,9,16], index: 0, kind: input, shape index: {}]   ;;  %s1587_s1 = inlined_call_operand.vmem [shape: bf16[9,16,32], index: 1, kind: input, shape index: {}]   ;;  %s1588_s2 = inlined_call_operand.vmem [shape: f32[1,32], index: 2, kind: input, shape index: {}]   ;;  %s1589_s3 = inlined_call_operand.vmem [shape: bf16[2,4,8,32], index: 3, kind: output, shape index: {}]  }
   0x1 LB: > { %s1157_s13 = sadd.s32 4294967295, %s1415_s12   ;;  %p1161_p0 = scmp.ge.s32.totalorder %s1415_s12, 1  ;;  %s1415_s12 = sphi %s1437_s12, %s13_s12  }
   0x2   : > { %p137_p1 = scmp.lt.s32.totalorder %s1415_s12, 3 }
   0x4   : > { %p138_p2 = pnand %p1161_p0, %p137_p1 }
   0x5   : > { %v1388_v0 = vld [vmem:[%s1587_s1 + $0x20] sm:$0xff] (!%p138_p2)   ;;  %p161_p3 = scmp.lt.s32.totalorder (!%p138_p2), %s1157_s13, 1  ;;  %v1389_v1 = vld [vmem:[%s1587_s1 + $0x8] sm:$0xff] (!%p138_p2)   ;;  %vm202_vm0 = vcmask (!%p138_p2), 130048   ;;  %vm337_vm1 = vsmask.f32 (!%p138_p2), 3328 }
   0x6   : > { %141 = sbr.rel (%p138_p2) target bundleno = 295 (0x127), region = 32  ;;  %1317 = vmatprep.subr.bf16.mxu0 (!%p138_p2), %v1388_v0  ;;  %v1392_v2 = vld [vmem:[%s1587_s1 + $0x28] sm:$0xff] (!%p138_p2)   ;;  %1293 = vmatprep.subr.bf16.mxu1 (!%p138_p2), %v1389_v1  ;;  %v1395_v3 = vld [vmem:[%s1587_s1] sm:$0xff] (!%p138_p2)   ;;  %vm338_vm2 = vsmask.f32 (!%p138_p2), 7440  ;;  %v1470_v6 = vld [vmem:[%s1587_s1 + $0x30] sm:$0xff] (!%p138_p2)  }
   0x7   : > { %1318 = vmatpush3.bf16.msra.mxu0 (!%p138_p2), %v1388_v0  ;;  %1294 = vmatpush3.bf16.msra.mxu1 (!%p138_p2), %v1389_v1  ;;  %v1475_v7 = vld [vmem:[%s1587_s1 + $0x10] sm:$0xff] (!%p138_p2)   ;;  %vm1498_vm3 = vmor (!%p138_p2), %vm337_vm1, %vm338_vm2  ;;  %v1514_v0 = vld [vmem:[%s1587_s1 + $0x18] sm:$0xff] (!%p138_p2)   ;;  %vm1097_vm4 = vcmask (!%p138_p2), 257024  }
   0x8   : > { %1323 = vmatprep.subr.bf16.mxu0 (!%p138_p2), %v1392_v2  ;;  %1299 = vmatprep.subr.bf16.mxu1 (!%p138_p2), %v1395_v3 }
   0xd   : > { %s1593_s13 = smov (!%p161_p3, %s1157_s13), 1 }
   0xe   : > { %s1379_s22 = smul.u32 160, %s1593_s13  ;;  %s1265_s11 = sshll.u32 %s1593_s13, 4 }
   0xf   : > { %s170_s16 = scalar_lea.vmem %s1589_s3, %s1265_s11 }
  0x10   : > { %s1463_s25 = scalar_lea.vmem %s1586_s0, %s1379_s22 }
  0x11   : > { %v1390_v4 = vld [vmem:[%s1463_s25 + $0x28] ss:$8 sps:$4 sm:$0xff]   ;;  %v1391_v5 = vld [vmem:[%s1463_s25 + $0x78] ss:$8 sps:$4 sm:$0xff]   ;;  %v1211_v12 = vld [vmem:[%s1463_s25 + $0x54] sm:$0x1] }
  0x12   : > { %1295 = vmatprep.mubr.msk.bf16.mxu1 %vm202_vm0, %v1390_v4  ;;  %v1393_v8 = vld [vmem:[%s1463_s25 + $0x38] ss:$8 sps:$4 sm:$0xff]   ;;  %1319 = vmatprep.mubr.msk.bf16.mxu0 %vm202_vm0, %v1391_v5  ;;  %v1394_v9 = vld [vmem:[%s1463_s25 + $0x88] ss:$8 sps:$4 sm:$0xff]   ;;  %v1213_v14 = vld [vmem:[%s1463_s25 + $0x5c] sm:$0x1] }
  0x13   : > { %1296 = vmatmul.mubr.msk.bf16.vlgmr.msra.gmra.mrb[0].mxu1 %vm202_vm0, %v1393_v8  ;;  %v1396_v10 = vld [vmem:[%s1463_s25] ss:$8 sps:$4 sm:$0xff]   ;;  %1320 = vmatmul.mubr.msk.bf16.vlgmr.msra.gmra.mrb[0].mxu0 %vm202_vm0, %v1394_v9  ;;  %v1210_v11 = vld [vmem:[%s1463_s25 + $0x50] sm:$0xf]  ;;  %v1212_v13 = vld [vmem:[%s1463_s25 + $0x58] sm:$0xf] }
  0x14   : > { %1300 = vmatpush3.bf16.msra.mxu1 %v1395_v3  ;;  %1324 = vmatpush3.bf16.msra.mxu0 %v1392_v2  ;;  %v645_v15 = vshrl.u32 %v1210_v11, 16  ;;  %v648_v16 = vshll.u32 %v1210_v11, 16  ;;  %v654_v17 = vshll.u32 %v1211_v12, 16  ;;  %v659_v18 = vshrl.u32 %v1212_v13, 16  ;;  %v1214_v27 = vld [vmem:[%s1463_s25 + $0x60] sm:$0xf] }
  0x15   : > { %1301 = vmatprep.mubr.msk.bf16.mxu1 %vm202_vm0, %v1396_v10  ;;  %v662_v19 = vshll.u32 %v1212_v13, 16  ;;  %v668_v20 = vshll.u32 %v1213_v14, 16  ;;  %1329 = vmatprep.subr.bf16.mxu0 %v1470_v6  ;;  %v1215_v28 = vld [vmem:[%s1463_s25 + $0x64] sm:$0x1]  ;;  %v1398_v30 = vld [vmem:[%s1463_s25 + $0x10] ss:$8 sps:$4 sm:$0xff]  }
  0x16   : > { %1305 = vmatprep.subr.bf16.mxu1 %v1475_v7  ;;  %v647_v21 = vrot.slane %v645_v15, 4  ;;  %v650_v22 = vrot.slane %v648_v16, 5  ;;  %v656_v23 = vrot.slane %v654_v17, 5  ;;  %v661_v24 = vrot.slane %v659_v18, 4  ;;  %v1216_v31 = vld [vmem:[%s1463_s25 + $0x68] sm:$0xf] }
  0x17   : > { %v664_v25 = vrot.slane %v662_v19, 5  ;;  %v670_v26 = vrot.slane %v668_v20, 5  ;;  %v1217_v32 = vld [vmem:[%s1463_s25 + $0x6c] sm:$0x1]  ;;  %v673_v33 = vshrl.u32 %v1214_v27, 16  ;;  %v676_v34 = vshll.u32 %v1214_v27, 16 }
  0x18   : > { %v651_v29 = vor.u32 %v650_v22, %v647_v21  ;;  %v682_v37 = vshll.u32 %v1215_v28, 16  ;;  %v687_v38 = vshrl.u32 %v1216_v31, 16  ;;  %v690_v39 = vshll.u32 %v1216_v31, 16  ;;  %v329_v40 = vld [vmem:[%s1463_s25] sm:$0xf]  ;;  %v1401_v20 = vld [vmem:[%s1587_s1 + $0x38] sm:$0xff]  }
  0x19   : > { %v665_v36 = vor.u32 %v664_v25, %v661_v24  ;;  %v675_v42 = vrot.slane %v673_v33, 4  ;;  %v678_v43 = vrot.slane %v676_v34, 5  ;;  %v696_v44 = vshll.u32 %v1217_v32, 16  ;;  %v330_v45 = vld [vmem:[%s1463_s25 + $0x4] sm:$0x1] }
  0x1a   : > { %v652_v41 = vrot.slane %v651_v29, 4  ;;  %v684_v47 = vrot.slane %v682_v37, 5  ;;  %v689_v48 = vrot.slane %v687_v38, 4  ;;  %v692_v49 = vrot.slane %v690_v39, 5  ;;  %v331_v50 = vld [vmem:[%s1463_s25 + $0x8] sm:$0xf] }
  0x1b   : > { %v666_v46 = vrot.slane %v665_v36, 4  ;;  %v679_v52 = vor.u32 %v678_v43, %v675_v42  ;;  %v698_v53 = vrot.slane %v696_v44, 5  ;;  %v341_v54 = vshrl.u32 %v329_v40, 16  ;;  %v332_v57 = vld [vmem:[%s1463_s25 + $0xc] sm:$0x1] }
  0x1c   : > { %v657_v51 = vsel %vm1498_vm3, %v652_v41, %v656_v23  ;;  %v693_v56 = vor.u32 %v692_v49, %v689_v48  ;;  %v344_v58 = vshll.u32 %v329_v40, 16  ;;  %v350_v59 = vshll.u32 %v330_v45, 16  ;;  %v1400_v5 = vld [vmem:[%s1463_s25 + $0x8] ss:$8 sps:$4 sm:$0xff]   ;;  %v334_v12 = vld [vmem:[%s1463_s25 + $0x14] sm:$0x1] }
  0x1d   : > { %v671_v55 = vsel %vm1498_vm3, %v666_v46, %v670_v26  ;;  %v680_v61 = vrot.slane %v679_v52, 4  ;;  %v343_v62 = vrot.slane %v341_v54, 4  ;;  %v355_v63 = vshrl.u32 %v331_v50, 16  ;;  %v333_v11 = vld [vmem:[%s1463_s25 + $0x10] sm:$0xf]  ;;  %v1406_v46 = vld [vmem:[%s1587_s1 + $0x40] sm:$0xff]  }
  0x1e   : > { %v1220_v60 = vcombine.low %v657_v51, %v671_v55  ;;  %v694_v1 = vrot.slane %v693_v56, 4  ;;  %v346_v2 = vrot.slane %v344_v58, 5  ;;  %v352_v3 = vrot.slane %v350_v59, 5  ;;  %v335_v15 = vld [vmem:[%s1463_s25 + $0x18] sm:$0xf] }
  0x1f   : > { %1302 = vmatmul.mubr.msk.bf16.vlgmr.msra.gmra.mrb[0].mxu1 %vm202_vm0, %v1398_v30  ;;  %v358_v4 = vshll.u32 %v331_v50, 16  ;;  %v685_v8 = vsel %vm1498_vm3, %v680_v61, %v684_v47  ;;  %v357_v9 = vrot.slane %v355_v63, 4  ;;  %v364_v10 = vshll.u32 %v332_v57, 16  ;;  %v336_v16 = vld [vmem:[%s1463_s25 + $0x1c] sm:$0x1] }
  0x20   : > { %1306 = vmatpush3.bf16.msra.mxu1 %v1475_v7  ;;  %1325 = vmatprep.mubr.msk.bf16.mxu0 %vm202_vm0, %v1220_v60  ;;  %v699_v13 = vsel %vm1498_vm3, %v694_v1, %v698_v53  ;;  %v347_v7 = vor.u32 %v346_v2, %v343_v62  ;;  %v369_v17 = vshrl.u32 %v333_v11, 16  ;;  %v372_v21 = vshll.u32 %v333_v11, 16  ;;  %v1402_v43 = vld [vmem:[%s1463_s25 + $0x18] ss:$8 sps:$4 sm:$0xff]   ;;  %v1247_v44 = vld [vmem:[%s1463_s25 + $0x8] sm:$0xf] }
  0x21   : > { %1311 = vmatprep.subr.bf16.mxu1 %v1514_v0  ;;  %v360_v14 = vrot.slane %v358_v4, 5  ;;  %v1221_v18 = vcombine.low %v685_v8, %v699_v13  ;;  %v366_v19 = vrot.slane %v364_v10, 5  ;;  %v378_v22 = vshll.u32 %v334_v12, 16  ;;  %v1248_v47 = vld [vmem:[%s1463_s25 + $0xc] sm:$0x1] }
  0x22   : > { %v348_v23 = vrot.slane %v347_v7, 4  ;;  %v371_v25 = vrot.slane %v369_v17, 4  ;;  %v383_v26 = vshrl.u32 %v335_v15, 16  ;;  %v374_v27 = vrot.slane %v372_v21, 5  ;;  %v1249_v48 = vld [vmem:[%s1463_s25 + $0x10] sm:$0xf] }
  0x23   : > { %v361_v24 = vor.u32 %v360_v14, %v357_v9  ;;  %1326 = vmatmul.mubr.msk.bf16.vlgmr.msra.gmra.mrb[0].mxu0 %vm202_vm0, %v1221_v18  ;;  %v386_v28 = vshll.u32 %v335_v15, 16  ;;  %v392_v29 = vshll.u32 %v336_v16, 16  ;;  %v380_v34 = vrot.slane %v378_v22, 5  ;;  %v1250_v49 = vld [vmem:[%s1463_s25 + $0x14] sm:$0x1] }
  0x24   : > { %1330 = vmatpush3.bf16.msra.mxu0 %v1470_v6  ;;  %v353_v30 = vsel %vm1498_vm3, %v348_v23, %v352_v3  ;;  %1331 = vmatprep.mubr.msk.bf16.mxu0 %vm202_vm0, %v1400_v5  ;;  %v385_v32 = vrot.slane %v383_v26, 4  ;;  %v375_v33 = vor.u32 %v374_v27, %v371_v25  ;;  %v1404_v51 = vld [vmem:[%s1463_s25 + $0x50] ss:$8 sps:$4 sm:$0xff]   ;;  %v949_v53 = vshrl.u32 %v1247_v44, 16  ;;  %v1253_v62 = vld [vmem:[%s1463_s25 + $0x20] sm:$0xf] }
  0x25   : > { %v362_v31 = vrot.slane %v361_v24, 4  ;;  %1335 = vmatprep.subr.bf16.mxu0 %v1401_v20  ;;  %v388_v36 = vrot.slane %v386_v28, 5  ;;  %v394_v40 = vrot.slane %v392_v29, 5  ;;  %v1405_v52 = vld [vmem:[%s1463_s25 + $0x30] ss:$8 sps:$4 sm:$0xff]   ;;  %v952_v54 = vshll.u32 %v1247_v44, 16 }
  0x26   : > { %v376_v38 = vrot.slane %v375_v33, 4  ;;  %v958_v55 = vshll.u32 %v1248_v47, 16  ;;  %v963_v56 = vshrl.u32 %v1249_v48, 16  ;;  %v966_v57 = vshll.u32 %v1249_v48, 16  ;;  %v1251_v59 = vld [vmem:[%s1463_s25 + $0x18] sm:$0xf] }
  0x27   : > { %v367_v37 = vsel %vm1498_vm3, %v362_v31, %v366_v19  ;;  %v389_v39 = vor.u32 %v388_v36, %v385_v32  ;;  %v972_v58 = vshll.u32 %v1250_v49, 16  ;;  %v951_v60 = vrot.slane %v949_v53, 4  ;;  %v1252_v13 = vld [vmem:[%s1463_s25 + $0x1c] sm:$0x1]  ;;  %v1254_v19 = vld [vmem:[%s1463_s25 + $0x24] sm:$0x1] }
  0x28   : > { %v1183_v6 = vcombine.low %v353_v30, %v367_v37  ;;  %v381_v41 = vsel %vm1498_vm3, %v376_v38, %v380_v34  ;;  %v954_v61 = vrot.slane %v952_v54, 5  ;;  %v965_v63 = vrot.slane %v963_v56, 4  ;;  %v1408_v21 = vld [vmem:[%s1463_s25 + $0x40] ss:$8 sps:$4 sm:$0xff]  }
  0x29   : > { %v390_v42 = vrot.slane %v389_v39, 4  ;;  %v968_v1 = vrot.slane %v966_v57, 5  ;;  %v977_v3 = vshrl.u32 %v1251_v59, 16  ;;  %v980_v4 = vshll.u32 %v1251_v59, 16  ;;  %v1262_v39 = vld [vmem:[%s1588_s2] ss:$0 sm:$0xff] }
  0x2a   : > { %1307 = vmatprep.mubr.msk.bf16.mxu1 %vm202_vm0, %v1183_v6  ;;  %v955_v2 = vor.u32 %v954_v61, %v951_v60  ;;  %v991_v5 = vshrl.u32 %v1253_v62, 16  ;;  %v960_v8 = vrot.slane %v958_v55, 5  ;;  %v974_v10 = vrot.slane %v972_v58, 5 }
  0x2b   : > { %v395_v45 = vsel %vm1498_vm3, %v390_v42, %v394_v40  ;;  %v969_v9 = vor.u32 %v968_v1, %v965_v63  ;;  %v979_v7 = vrot.slane %v977_v3, 4  ;;  %v982_v14 = vrot.slane %v980_v4, 5 }
  0x2c   : > { %v1184_v50 = vcombine.low %v381_v41, %v395_v45  ;;  %v956_v11 = vrot.slane %v955_v2, 4  ;;  %v993_v15 = vrot.slane %v991_v5, 4  ;;  %v986_v22 = vshll.u32 %v1252_v13, 16 }
  0x2d   : > { %v970_v12 = vrot.slane %v969_v9, 4  ;;  %v983_v24 = vor.u32 %v982_v14, %v979_v7  ;;  %v1000_v26 = vshll.u32 %v1254_v19, 16 }
  0x2e   : > { %1308 = vmatmul.mubr.msk.bf16.vlgmr.msra.gmra.mrb[0].mxu1 %vm202_vm0, %v1184_v50  ;;  %v961_v17 = vsel %vm1498_vm3, %v956_v11, %v960_v8  ;;  %v988_v28 = vrot.slane %v986_v22, 5 }
  0x2f   : > { %1332 = vmatmul.mubr.msk.bf16.vlgmr.msra.gmra.mrb[0].mxu0 %vm202_vm0, %v1402_v43  ;;  %1312 = vmatpush3.bf16.msra.mxu1 %v1514_v0  ;;  %v994_v0 = vshll.u32 %v1253_v62, 16  ;;  %v975_v18 = vsel %vm1498_vm3, %v970_v12, %v974_v10  ;;  %v984_v27 = vrot.slane %v983_v24, 4  ;;  %v1002_v30 = vrot.slane %v1000_v26, 5 }
  0x30   : > { %1336 = vmatpush3.bf16.msra.mxu0 %v1401_v20  ;;  %1313 = vmatprep.mubr.msk.bf16.mxu1 %vm202_vm0, %v1404_v51  ;;  %v1407_v20 = vld [vmem:[%s1463_s25 + $0x60] ss:$8 sps:$4 sm:$0xff]   ;;  %v1257_v23 = vcombine.low %v961_v17, %v975_v18 }
  0x31   : > { %1337 = vmatprep.mubr.msk.bf16.mxu0 %vm202_vm0, %v1405_v52  ;;  %1341 = vmatprep.subr.bf16.mxu0 %v1406_v46  ;;  %v996_v16 = vrot.slane %v994_v0, 5  ;;  %v989_v31 = vsel %vm1498_vm3, %v984_v27, %v988_v28 }
  0x33   : > { %v997_v25 = vor.u32 %v996_v16, %v993_v15 }
  0x35   : > { %v998_v29 = vrot.slane %v997_v25, 4 }
  0x37   : > { %v1003_v32 = vsel %vm1498_vm3, %v998_v29, %v1002_v30 }
  0x38   : > { %v1258_v33 = vcombine.low %v989_v31, %v1003_v32 }
  0x3a   : > { %1314 = vmatmul.mubr.msk.bf16.vlgmr.msra.gmra.mrb[0].mxu1 %vm202_vm0, %v1407_v20 }
  0x3b   : > { %1338 = vmatmul.mubr.msk.bf16.vlgmr.msra.gmra.mrb[0].mxu0 %vm202_vm0, %v1408_v21 }
  0x3c   : > { %1342 = vmatpush3.bf16.msra.mxu0 %v1406_v46  ;;  %1343 = vmatprep.mubr.msk.bf16.mxu0 %vm202_vm0, %v1257_v23 }
  0x47   : > { %1344 = vmatmul.mubr.msk.bf16.vlgmr.msra.gmra.mrb[0].mxu0 %vm202_vm0, %v1258_v33 }
 0x10d   : > { %v1315_v34 = vpop.f32.mrb[0].mxu1 }
 0x10e   : > { %v534_v36 = vpop.f32.mrb[1].mxu1 }
 0x10f   : > { %v1316_v37 = vpop.f32.mrb[2].mxu1 }
 0x110   : > { %v537_v6 = vpop.f32.mrb[3].mxu1 }
 0x11a   : > { %v1345_v38 = vpop.f32.mrb[0].mxu0 }
 0x11b   : > { %v1347_v40 = vadd.f32 %v1345_v38, %v1315_v34  ;;  %v1059_v41 = vpop.f32.mrb[1].mxu0 }
 0x11c   : > { %v1348_v42 = vadd.f32 %v1059_v41, %v534_v36  ;;  %v1346_v43 = vpop.f32.mrb[2].mxu0 }
 0x11d   : > { %v1087_v44 = vadd.f32 %v1347_v40, %v1262_v39  ;;  %v1349_v35 = vadd.f32 %v1346_v43, %v1316_v37  ;;  %v1062_v45 = vpop.f32.mrb[3].mxu0 }
 0x11e   : > { %v1085_v46 = vadd.f32 %v1348_v42, %v1262_v39  ;;  %v1350_v47 = vadd.f32 %v1062_v45, %v537_v6 }
 0x11f   : > { %v1091_v48 = vmax.f32 %v1087_v44, 0.0  ;;  %v1088_v49 = vadd.f32 %v1349_v35, %v1262_v39 }
 0x120   : > { %v1089_v50 = vmax.f32 %v1085_v46, 0.0  ;;  %v1086_v51 = vadd.f32 %v1350_v47, %v1262_v39 }
 0x121   : > { %v1095_v52 = vpack.c.bf16 %v1091_v48, %v1091_v48  ;;  %v1092_v53 = vmax.f32 %v1088_v49, 0.0 }
 0x122   : > { %v1093_v54 = vpack.c.bf16 %v1089_v50, %v1089_v50  ;;  %v1090_v55 = vmax.f32 %v1086_v51, 0.0 }
 0x123   : > { %1100 = vst.msk [vmem:[%s170_s16 + $0x8] sm:$0xf] %vm1097_vm4, %v1095_v52  ;;  %v1096_v56 = vpack.c.bf16 %v1092_v53, %v1092_v53 }
 0x124   : > { %1098 = vst.msk [vmem:[%s170_s16] sm:$0xf] %vm1097_vm4, %v1093_v54  ;;  %v1094_v57 = vpack.c.bf16 %v1090_v55, %v1090_v55 }
 0x125   : > { %1101 = vst.msk [vmem:[%s170_s16 + $0xc] sm:$0xf] %vm1097_vm4, %v1096_v56 }
 0x126   : > { %1099 = vst.msk [vmem:[%s170_s16 + $0x4] sm:$0xf] %vm1097_vm4, %v1094_v57 }
 0x127 PF: > { %s13_s12 = sadd.s32 1, %s1415_s12  }
 0x128   : > { %p10_p4 = scmp.ge.s32.totalorder %s13_s12, 4  }
 0x12a   :  { %12 = sbr.rel (!%p10_p4) target bundleno = 1 (0x1), region = 75 }

</bundles_post_ra>
